<compile_context>
chip_gen: v6e
topology: v6e:2x2x1
jax: 0.10.0
libtpu: 0.0.40
codegen_flags: <defaults>
</compile_context>

<pallas_src>
import functools

import jax
import jax.numpy as jnp
from jax.experimental import pallas as pl
from jax.experimental.pallas import tpu as pltpu


_NEG_BIG = -1e30   # large finite negative (no -inf => no NaN edge cases)


def _weight_spec(shape, index_map, single_buffer):
    """BlockSpec for a constant-index weight block (optionally single-buffered)."""
    if single_buffer:
        return pl.BlockSpec(shape, index_map, pipeline_mode=pl.Buffered(1))
    return pl.BlockSpec(shape, index_map)


# ---------------------------------------------------------------------------
# Stage 1: fused QKV projection -> head-major (B, H, S, Dh) bf16 Q, K, V.
# ---------------------------------------------------------------------------

def _qkv_proj_kernel(x_ref, w3_ref, q_ref, k_ref, v_ref, *, heads, dim_head):
    x2d = x_ref[0]                                    # (block_s, D) bf16
    Dh = dim_head
    # Static unroll over heads (H is small).  Each matmul is (block_s, D) x
    # (D, 3*Dh): the fused per-head Q|K|V weight keeps the MXU output width at
    # 3*Dh, and there is no broadcast of x and no transpose anywhere.
    for h in range(heads):
        qkv = jnp.dot(x2d, w3_ref[h], preferred_element_type=jnp.float32)
        q_ref[0, h] = qkv[:, :Dh].astype(q_ref.dtype)          # already scaled
        k_ref[0, h] = qkv[:, Dh:2 * Dh].astype(k_ref.dtype)
        v_ref[0, h] = qkv[:, 2 * Dh:].astype(v_ref.dtype)


def _project_qkv(x, w3_h, *, heads, dim_head, block_s, compute_dtype,
                 single_buffer_weights, vmem_limit_bytes):
    B, S, D = x.shape
    H, Dh = heads, dim_head
    qkv_shape = jax.ShapeDtypeStruct((B, H, S, Dh), compute_dtype)
    qkv_spec = pl.BlockSpec((1, H, block_s, Dh), lambda b, si: (b, 0, si, 0))
    kernel = functools.partial(_qkv_proj_kernel, heads=H, dim_head=Dh)
    return pl.pallas_call(
        kernel,
        out_shape=(qkv_shape, qkv_shape, qkv_shape),
        grid_spec=pltpu.PrefetchScalarGridSpec(
            num_scalar_prefetch=0,
            grid=(B, S // block_s),
            in_specs=[
                pl.BlockSpec((1, block_s, D), lambda b, si: (b, si, 0)),
                _weight_spec((H, D, 3 * Dh), lambda b, si: (0, 0, 0),
                             single_buffer_weights),
            ],
            out_specs=(qkv_spec, qkv_spec, qkv_spec),
        ),
        compiler_params=pltpu.CompilerParams(
            dimension_semantics=("parallel", "parallel"),
            vmem_limit_bytes=vmem_limit_bytes,
        ),
    )(x, w3_h)


# ---------------------------------------------------------------------------
# Stage 2: flash attention over a compacted (qi, ki) tile table + fused W_out.
# ---------------------------------------------------------------------------

def _flash_attn_kernel(qt_ref, kt_ref,                  # scalar prefetch (SMEM)
                       q_ref, k_ref, v_ref, wout_ref,   # inputs (VMEM)
                       o_ref,                           # output (VMEM)
                       m_scr, l_scr, acc_scr,           # scratch (VMEM)
                       *, heads, block_q, block_kv, causal, num_kv_tiles,
                       compute_dtype, approx_recip):
    t = pl.program_id(1)
    qi = qt_ref[t]
    ki = kt_ref[t]

    # ---- first kv tile of this q tile: reset online-softmax state ----------
    @pl.when(ki == 0)
    def _init():
        m_scr[...] = jnp.full_like(m_scr, _NEG_BIG)
        l_scr[...] = jnp.zeros_like(l_scr)
        acc_scr[...] = jnp.zeros_like(acc_scr)

    # ---- attend: every step of the compacted table does real work ----------
    q = q_ref[0]                                        # (H, tq, Dh) bf16
    k = k_ref[0]                                        # (H, tk, Dh) bf16
    v = v_ref[0]                                        # (H, tk, Dh) bf16
    s = jnp.einsum('hqd,hkd->hqk', q, k,
                   preferred_element_type=jnp.float32)  # (H, tq, tk) f32

    if causal:
        # Only the diagonal tile (ki == qi) has masked entries; below-diagonal
        # tiles get an all-zero bias (cheap VALU add).
        rows = qi * block_q + jax.lax.broadcasted_iota(
            jnp.int32, (block_q, block_kv), 0)
        cols = ki * block_kv + jax.lax.broadcasted_iota(
            jnp.int32, (block_q, block_kv), 1)
        bias = jnp.where(cols > rows, jnp.float32(_NEG_BIG), jnp.float32(0.0))
        s = s + bias[None, :, :]

    m_prev = m_scr[...]                                            # (H, tq, 128)
    m_next = jnp.maximum(m_prev, jnp.max(s, axis=-1, keepdims=True))
    alpha = jnp.exp(m_prev - m_next)                               # (H, tq, 128)
    p = jnp.exp(s - m_next[..., :1])                               # (H, tq, tk)
    l_scr[...] = alpha * l_scr[...] + jnp.sum(p, axis=-1, keepdims=True)
    pv = jnp.einsum('hqk,hkd->hqd', p.astype(compute_dtype), v,
                    preferred_element_type=jnp.float32)            # (H, tq, Dh)
    acc_scr[...] = alpha[..., :1] * acc_scr[...] + pv
    m_scr[...] = m_next

    # ---- last kv tile of this q tile: normalize + fused output projection --
    is_last = (ki == qi) if causal else (ki == num_kv_tiles - 1)

    @pl.when(is_last)
    def _finalize():
        inv_l = pl.reciprocal(l_scr[...][..., :1], approx=approx_recip)
        out_h = (acc_scr[...] * inv_l).astype(compute_dtype)       # (H, tq, Dh)
        D = o_ref.shape[-1]
        # concat_h(out_h) @ W_out^T == sum_h out_h @ W_out_h, accumulated into
        # a single lane-dense (tq, D) f32 buffer (no (H, tq, D) intermediate,
        # no cross-sublane reduction).
        acc = jnp.zeros((block_q, D), jnp.float32)
        for h in range(heads):
            acc = acc + jnp.dot(out_h[h], wout_ref[h],
                                preferred_element_type=jnp.float32)
        o_ref[0] = acc.astype(o_ref.dtype)


def _flash_attention(q, k, v, wout_h, qt_tbl, kt_tbl, *, block_q, block_kv,
                     causal, num_kv_tiles, out_dtype, compute_dtype,
                     approx_recip, single_buffer_weights, vmem_limit_bytes):
    B, H, S, Dh = q.shape
    D = wout_h.shape[-1]
    n_tiles = qt_tbl.shape[0]

    kernel = functools.partial(
        _flash_attn_kernel, heads=H, block_q=block_q, block_kv=block_kv,
        causal=causal, num_kv_tiles=num_kv_tiles, compute_dtype=compute_dtype,
        approx_recip=approx_recip)

    return pl.pallas_call(
        kernel,
        out_shape=jax.ShapeDtypeStruct((B, S, D), out_dtype),
        grid_spec=pltpu.PrefetchScalarGridSpec(
            num_scalar_prefetch=2,
            grid=(B, n_tiles),
            in_specs=[
                pl.BlockSpec((1, H, block_q, Dh),
                             lambda b, t, qt, kt: (b, 0, qt[t], 0)),
                pl.BlockSpec((1, H, block_kv, Dh),
                             lambda b, t, qt, kt: (b, 0, kt[t], 0)),
                pl.BlockSpec((1, H, block_kv, Dh),
                             lambda b, t, qt, kt: (b, 0, kt[t], 0)),
                _weight_spec((H, Dh, D), lambda b, t, qt, kt: (0, 0, 0),
                             single_buffer_weights),
            ],
            out_specs=pl.BlockSpec((1, block_q, D),
                                   lambda b, t, qt, kt: (b, qt[t], 0)),
            scratch_shapes=[
                pltpu.VMEM((H, block_q, 128), jnp.float32),  # running max  m
                pltpu.VMEM((H, block_q, 128), jnp.float32),  # running sum  l
                pltpu.VMEM((H, block_q, Dh), jnp.float32),   # running numerator
            ],
        ),
        compiler_params=pltpu.CompilerParams(
            # The compacted tile axis mixes q tiles with the kv reduction, so
            # it must be "arbitrary"; megacore parallelism comes from batch.
            dimension_semantics=("parallel", "arbitrary"),
            vmem_limit_bytes=vmem_limit_bytes,
        ),
    )(qt_tbl, kt_tbl, q, k, v, wout_h)


# ---------------------------------------------------------------------------
# Public wrapper (matches the PyTorch module's forward, bias-free linears).
# ---------------------------------------------------------------------------

def mhsa_forward(x, w_qkv, w_out, *, heads, dim_head, causal=True,
                 block_q=None, block_kv=None, block_proj=None,
                 compute_dtype=jnp.bfloat16, out_dtype=jnp.float32,
                 approx_recip=False, single_buffer_weights=True,
                 vmem_limit_bytes=None):
    """Multi-head self-attention forward.

    x      : (B, S, D)
    w_qkv  : (3*H*Dh, D)  -- nn.Linear(dim, 3*H*Dh, bias=False).weight layout
    w_out  : (D, H*Dh)    -- nn.Linear(H*Dh, dim, bias=False).weight layout
    """
    # TODO(synk): the optional key-padding `mask` argument of the PyTorch
    # forward is not implemented.
    B, S, D = x.shape
    H, Dh = heads, dim_head
    _dim = H * Dh
    assert w_qkv.shape == (3 * _dim, D)
    assert w_out.shape == (D, _dim)

    # Tile defaults: 256 suits v6e/v7x (raise to 512 on v5e/v6e's 128 MiB VMEM
    # once profiling confirms headroom; keep 128-256 on v5e; on v7x pass
    # vmem_limit_bytes explicitly, e.g. 48 MiB, before raising tiles).
    if block_q is None:
        block_q = min(256, S)
    if block_kv is None:
        block_kv = min(256, S)
    if block_proj is None:
        block_proj = min(512, S)
        if S % block_proj:
            block_proj = block_q
    assert S % block_q == 0 and S % block_kv == 0 and S % block_proj == 0
    if causal:
        assert block_q == block_kv, "causal tile compaction assumes square tiles"
    nq, nk = S // block_q, S // block_kv

    # ---- host-side weight prep (layout plumbing only; in real use these would
    # be precomputed once and cached rather than rebuilt per call) ------------
    w_q, w_k, w_v = jnp.split(w_qkv.astype(jnp.float32), 3, axis=0)   # (H*Dh, D)

    def per_head_in_major(w):                          # (H*Dh, D) -> (H, D, Dh)
        return jnp.transpose(w.reshape(H, Dh, D), (0, 2, 1))

    scale = Dh ** -0.5
    wq_h = per_head_in_major(w_q) * scale              # fold softmax scale into W_q
    wk_h = per_head_in_major(w_k)
    wv_h = per_head_in_major(w_v)
    w3_h = jnp.concatenate([wq_h, wk_h, wv_h], axis=-1).astype(compute_dtype)
    wout_h = w_out.T.reshape(H, Dh, D).astype(compute_dtype)          # (H, Dh, D)

    x_c = x.astype(compute_dtype)

    # ---- compacted (qi, ki) tile table (scalar-prefetched into SMEM) --------
    if causal:
        pairs = [(qi, ki) for qi in range(nq) for ki in range(qi + 1)]
    else:
        pairs = [(qi, ki) for qi in range(nq) for ki in range(nk)]
    qt_tbl = jnp.asarray([p[0] for p in pairs], dtype=jnp.int32)
    kt_tbl = jnp.asarray([p[1] for p in pairs], dtype=jnp.int32)

    def _run(single_buf):
        q, k, v = _project_qkv(
            x_c, w3_h, heads=H, dim_head=Dh, block_s=block_proj,
            compute_dtype=compute_dtype, single_buffer_weights=single_buf,
            vmem_limit_bytes=vmem_limit_bytes)
        return _flash_attention(
            q, k, v, wout_h, qt_tbl, kt_tbl, block_q=block_q, block_kv=block_kv,
            causal=causal, num_kv_tiles=nk, out_dtype=out_dtype,
            compute_dtype=compute_dtype, approx_recip=approx_recip,
            single_buffer_weights=single_buf, vmem_limit_bytes=vmem_limit_bytes)

    if single_buffer_weights:
        try:
            return _run(True)
        except Exception:  # pragma: no cover
            # pl.Buffered(1) single-buffering rejected by this JAX/Mosaic
            # build; fall back to default double-buffered weight blocks.
            pass
    return _run(False)


# ---------------------------------------------------------------------------
# Pure-JAX (f32) reference mirroring the PyTorch forward.
# ---------------------------------------------------------------------------

def _mhsa_reference(x, w_qkv, w_out, *, heads, dim_head, causal=True):
    b, s, d = x.shape
    _dim = heads * dim_head
    qkv = x @ w_qkv.T
    q, k, v = jnp.split(qkv, 3, axis=-1)

    def to_heads(t):
        return jnp.transpose(t.reshape(b, s, heads, dim_head), (0, 2, 1, 3))

    q, k, v = map(to_heads, (q, k, v))
    scores = jnp.einsum('bhid,bhjd->bhij', q, k) * dim_head ** (-0.5)
    if causal:
        mask = jnp.triu(jnp.ones((s, s), dtype=bool), k=1)
        scores = jnp.where(mask[None, None], -jnp.inf, scores)
    attn = jax.nn.softmax(scores, axis=-1)
    out = jnp.einsum('bhij,bhjd->bhid', attn, v)
    out = jnp.transpose(out, (0, 2, 1, 3)).reshape(b, s, _dim)
    return out @ w_out.T


if __name__ == "__main__":
    HEADS = 8

    def _check(B, S, D, causal, block=None, atol=5e-2, rtol=5e-2):
        dim_head = D // HEADS
        _dim = HEADS * dim_head
        key = jax.random.PRNGKey(0)
        kx, kq, ko = jax.random.split(key, 3)
        x = jax.random.normal(kx, (B, S, D), dtype=jnp.float32).astype(jnp.bfloat16)
        w_qkv = (jax.random.normal(kq, (3 * _dim, D), dtype=jnp.float32)
                 * D ** -0.5).astype(jnp.bfloat16)
        w_out = (jax.random.normal(ko, (D, _dim), dtype=jnp.float32)
                 * _dim ** -0.5).astype(jnp.bfloat16)

        out = mhsa_forward(x, w_qkv, w_out, heads=HEADS, dim_head=dim_head,
                           causal=causal, block_q=block, block_kv=block,
                           block_proj=block)
        out = jax.block_until_ready(out)

        ref = _mhsa_reference(x.astype(jnp.float32), w_qkv.astype(jnp.float32),
                              w_out.astype(jnp.float32),
                              heads=HEADS, dim_head=dim_head, causal=causal)
        assert out.shape == (B, S, D)
        err = float(jnp.max(jnp.abs(out - ref)))
        assert jnp.allclose(out, ref, atol=atol, rtol=rtol), (
            f"mismatch vs reference (B={B}, S={S}, D={D}, causal={causal}): "
            f"max abs err {err}")

    # Single-tile causal case (module defaults at small shapes).
    _check(B=2, S=8, D=32, causal=True)
    # Multi-tile causal: exercises the compacted tile table, the online softmax
    # across kv tiles, and the diagonal mask.
    _check(B=2, S=16, D=32, causal=True, block=8)
    # Non-causal paths (single- and multi-tile full table).
    _check(B=2, S=8, D=32, causal=False)
    _check(B=2, S=16, D=32, causal=False, block=8)
    # Slightly larger sanity check (wider lanes, several q/kv tiles).
    _check(B=2, S=64, D=128, causal=True, block=32)

    print("KERNEL_OK")
</pallas_src>

<mosaic_0001>
module attributes {stable_mosaic.version = 11 : i64} {
  func.func @_qkv_proj_kernel(%arg0: i32, %arg1: i32, %arg2: memref<1x8x32xbf16, #tpu.memory_space<vmem>>, %arg3: memref<8x32x12xbf16, #tpu.memory_space<vmem>>, %arg4: memref<1x8x8x4xbf16, #tpu.memory_space<vmem>>, %arg5: memref<1x8x8x4xbf16, #tpu.memory_space<vmem>>, %arg6: memref<1x8x8x4xbf16, #tpu.memory_space<vmem>>) attributes {dimension_semantics = [#tpu.dimension_semantics<parallel>, #tpu.dimension_semantics<parallel>], iteration_bounds = array<i64: 2, 1>, scalar_prefetch = 0 : i64, scratch_operands = 0 : i64, tpu.core_type = #tpu.core_type<tc>, window_params = [{transform_indices = @transform_0, window_bounds = array<i64: 1, 8, 32>}, {pipeline_mode = #tpu.pipeline_mode<synchronous>, transform_indices = @transform_1, window_bounds = array<i64: 8, 32, 12>}, {transform_indices = @transform_2, window_bounds = array<i64: 1, 8, 8, 4>}, {transform_indices = @transform_3, window_bounds = array<i64: 1, 8, 8, 4>}, {transform_indices = @transform_4, window_bounds = array<i64: 1, 8, 8, 4>}]} {
    %c0 = arith.constant 0 : index
    %c0_0 = arith.constant 0 : index
    %c0_1 = arith.constant 0 : index
    %0 = vector.load %arg2[%c0, %c0_0, %c0_1] : memref<1x8x32xbf16, #tpu.memory_space<vmem>>, vector<1x8x32xbf16>
    %1 = vector.shape_cast %0 : vector<1x8x32xbf16> to vector<8x32xbf16>
    %c0_2 = arith.constant 0 : index
    %c0_3 = arith.constant 0 : index
    %c0_4 = arith.constant 0 : index
    %2 = vector.load %arg3[%c0_2, %c0_3, %c0_4] : memref<8x32x12xbf16, #tpu.memory_space<vmem>>, vector<1x32x12xbf16>
    %3 = vector.shape_cast %2 : vector<1x32x12xbf16> to vector<32x12xbf16>
    %cst = arith.constant dense<0.000000e+00> : vector<8x12xf32>
    %4 = tpu.matmul %1, %3, %cst {dimension_numbers = #tpu.dot_dimension_numbers<[1], [0], [0], [1], [0, 0, 1, 1], [], []>} : vector<8x32xbf16>, vector<32x12xbf16>, vector<8x12xf32> -> vector<8x12xf32>
    %5 = vector.extract_strided_slice %4 {offsets = [0, 0], sizes = [8, 4], strides = [1, 1]} : vector<8x12xf32> to vector<8x4xf32>
    %6 = arith.truncf %5 : vector<8x4xf32> to vector<8x4xbf16>
    %c0_5 = arith.constant 0 : index
    %c0_6 = arith.constant 0 : index
    %c0_7 = arith.constant 0 : index
    %c0_8 = arith.constant 0 : index
    %7 = vector.load %arg4[%c0_5, %c0_6, %c0_7, %c0_8] : memref<1x8x8x4xbf16, #tpu.memory_space<vmem>>, vector<1x1x8x4xbf16>
    %8 = vector.shape_cast %7 : vector<1x1x8x4xbf16> to vector<8x4xbf16>
    %9 = vector.shape_cast %6 : vector<8x4xbf16> to vector<1x1x8x4xbf16>
    tpu.vector_store %arg4[%c0_5, %c0_6, %c0_7, %c0_8], %9 {strides = array<i32>} : memref<1x8x8x4xbf16, #tpu.memory_space<vmem>>, vector<1x1x8x4xbf16>,
    %10 = vector.extract_strided_slice %4 {offsets = [0, 4], sizes = [8, 4], strides = [1, 1]} : vector<8x12xf32> to vector<8x4xf32>
    %11 = arith.truncf %10 : vector<8x4xf32> to vector<8x4xbf16>
    %c0_9 = arith.constant 0 : index
    %c0_10 = arith.constant 0 : index
    %c0_11 = arith.constant 0 : index
    %c0_12 = arith.constant 0 : index
    %12 = vector.load %arg5[%c0_9, %c0_10, %c0_11, %c0_12] : memref<1x8x8x4xbf16, #tpu.memory_space<vmem>>, vector<1x1x8x4xbf16>
    %13 = vector.shape_cast %12 : vector<1x1x8x4xbf16> to vector<8x4xbf16>
    %14 = vector.shape_cast %11 : vector<8x4xbf16> to vector<1x1x8x4xbf16>
    tpu.vector_store %arg5[%c0_9, %c0_10, %c0_11, %c0_12], %14 {strides = array<i32>} : memref<1x8x8x4xbf16, #tpu.memory_space<vmem>>, vector<1x1x8x4xbf16>,
    %15 = vector.extract_strided_slice %4 {offsets = [0, 8], sizes = [8, 4], strides = [1, 1]} : vector<8x12xf32> to vector<8x4xf32>
    %16 = arith.truncf %15 : vector<8x4xf32> to vector<8x4xbf16>
    %c0_13 = arith.constant 0 : index
    %c0_14 = arith.constant 0 : index
    %c0_15 = arith.constant 0 : index
    %c0_16 = arith.constant 0 : index
    %17 = vector.load %arg6[%c0_13, %c0_14, %c0_15, %c0_16] : memref<1x8x8x4xbf16, #tpu.memory_space<vmem>>, vector<1x1x8x4xbf16>
    %18 = vector.shape_cast %17 : vector<1x1x8x4xbf16> to vector<8x4xbf16>
    %19 = vector.shape_cast %16 : vector<8x4xbf16> to vector<1x1x8x4xbf16>
    tpu.vector_store %arg6[%c0_13, %c0_14, %c0_15, %c0_16], %19 {strides = array<i32>} : memref<1x8x8x4xbf16, #tpu.memory_space<vmem>>, vector<1x1x8x4xbf16>,
    %c1 = arith.constant 1 : index
    %c0_17 = arith.constant 0 : index
    %c0_18 = arith.constant 0 : index
    %20 = vector.load %arg3[%c1, %c0_17, %c0_18] : memref<8x32x12xbf16, #tpu.memory_space<vmem>>, vector<1x32x12xbf16>
    %21 = vector.shape_cast %20 : vector<1x32x12xbf16> to vector<32x12xbf16>
    %cst_19 = arith.constant dense<0.000000e+00> : vector<8x12xf32>
    %22 = tpu.matmul %1, %21, %cst_19 {dimension_numbers = #tpu.dot_dimension_numbers<[1], [0], [0], [1], [0, 0, 1, 1], [], []>} : vector<8x32xbf16>, vector<32x12xbf16>, vector<8x12xf32> -> vector<8x12xf32>
    %23 = vector.extract_strided_slice %22 {offsets = [0, 0], sizes = [8, 4], strides = [1, 1]} : vector<8x12xf32> to vector<8x4xf32>
    %24 = arith.truncf %23 : vector<8x4xf32> to vector<8x4xbf16>
    %c0_20 = arith.constant 0 : index
    %c1_21 = arith.constant 1 : index
    %c0_22 = arith.constant 0 : index
    %c0_23 = arith.constant 0 : index
    %25 = vector.load %arg4[%c0_20, %c1_21, %c0_22, %c0_23] : memref<1x8x8x4xbf16, #tpu.memory_space<vmem>>, vector<1x1x8x4xbf16>
    %26 = vector.shape_cast %25 : vector<1x1x8x4xbf16> to vector<8x4xbf16>
    %27 = vector.shape_cast %24 : vector<8x4xbf16> to vector<1x1x8x4xbf16>
    tpu.vector_store %arg4[%c0_20, %c1_21, %c0_22, %c0_23], %27 {strides = array<i32>} : memref<1x8x8x4xbf16, #tpu.memory_space<vmem>>, vector<1x1x8x4xbf16>,
    %28 = vector.extract_strided_slice %22 {offsets = [0, 4], sizes = [8, 4], strides = [1, 1]} : vector<8x12xf32> to vector<8x4xf32>
    %29 = arith.truncf %28 : vector<8x4xf32> to vector<8x4xbf16>
    %c0_24 = arith.constant 0 : index
    %c1_25 = arith.constant 1 : index
    %c0_26 = arith.constant 0 : index
    %c0_27 = arith.constant 0 : index
    %30 = vector.load %arg5[%c0_24, %c1_25, %c0_26, %c0_27] : memref<1x8x8x4xbf16, #tpu.memory_space<vmem>>, vector<1x1x8x4xbf16>
    %31 = vector.shape_cast %30 : vector<1x1x8x4xbf16> to vector<8x4xbf16>
    %32 = vector.shape_cast %29 : vector<8x4xbf16> to vector<1x1x8x4xbf16>
    tpu.vector_store %arg5[%c0_24, %c1_25, %c0_26, %c0_27], %32 {strides = array<i32>} : memref<1x8x8x4xbf16, #tpu.memory_space<vmem>>, vector<1x1x8x4xbf16>,
    %33 = vector.extract_strided_slice %22 {offsets = [0, 8], sizes = [8, 4], strides = [1, 1]} : vector<8x12xf32> to vector<8x4xf32>
    %34 = arith.truncf %33 : vector<8x4xf32> to vector<8x4xbf16>
    %c0_28 = arith.constant 0 : index
    %c1_29 = arith.constant 1 : index
    %c0_30 = arith.constant 0 : index
    %c0_31 = arith.constant 0 : index
    %35 = vector.load %arg6[%c0_28, %c1_29, %c0_30, %c0_31] : memref<1x8x8x4xbf16, #tpu.memory_space<vmem>>, vector<1x1x8x4xbf16>
    %36 = vector.shape_cast %35 : vector<1x1x8x4xbf16> to vector<8x4xbf16>
    %37 = vector.shape_cast %34 : vector<8x4xbf16> to vector<1x1x8x4xbf16>
    tpu.vector_store %arg6[%c0_28, %c1_29, %c0_30, %c0_31], %37 {strides = array<i32>} : memref<1x8x8x4xbf16, #tpu.memory_space<vmem>>, vector<1x1x8x4xbf16>,
    %c2 = arith.constant 2 : index
    %c0_32 = arith.constant 0 : index
    %c0_33 = arith.constant 0 : index
    %38 = vector.load %arg3[%c2, %c0_32, %c0_33] : memref<8x32x12xbf16, #tpu.memory_space<vmem>>, vector<1x32x12xbf16>
    %39 = vector.shape_cast %38 : vector<1x32x12xbf16> to vector<32x12xbf16>
    %cst_34 = arith.constant dense<0.000000e+00> : vector<8x12xf32>
    %40 = tpu.matmul %1, %39, %cst_34 {dimension_numbers = #tpu.dot_dimension_numbers<[1], [0], [0], [1], [0, 0, 1, 1], [], []>} : vector<8x32xbf16>, vector<32x12xbf16>, vector<8x12xf32> -> vector<8x12xf32>
    %41 = vector.extract_strided_slice %40 {offsets = [0, 0], sizes = [8, 4], strides = [1, 1]} : vector<8x12xf32> to vector<8x4xf32>
    %42 = arith.truncf %41 : vector<8x4xf32> to vector<8x4xbf16>
    %c0_35 = arith.constant 0 : index
    %c2_36 = arith.constant 2 : index
    %c0_37 = arith.constant 0 : index
    %c0_38 = arith.constant 0 : index
    %43 = vector.load %arg4[%c0_35, %c2_36, %c0_37, %c0_38] : memref<1x8x8x4xbf16, #tpu.memory_space<vmem>>, vector<1x1x8x4xbf16>
    %44 = vector.shape_cast %43 : vector<1x1x8x4xbf16> to vector<8x4xbf16>
    %45 = vector.shape_cast %42 : vector<8x4xbf16> to vector<1x1x8x4xbf16>
    tpu.vector_store %arg4[%c0_35, %c2_36, %c0_37, %c0_38], %45 {strides = array<i32>} : memref<1x8x8x4xbf16, #tpu.memory_space<vmem>>, vector<1x1x8x4xbf16>,
    %46 = vector.extract_strided_slice %40 {offsets = [0, 4], sizes = [8, 4], strides = [1, 1]} : vector<8x12xf32> to vector<8x4xf32>
    %47 = arith.truncf %46 : vector<8x4xf32> to vector<8x4xbf16>
    %c0_39 = arith.constant 0 : index
    %c2_40 = arith.constant 2 : index
    %c0_41 = arith.constant 0 : index
    %c0_42 = arith.constant 0 : index
    %48 = vector.load %arg5[%c0_39, %c2_40, %c0_41, %c0_42] : memref<1x8x8x4xbf16, #tpu.memory_space<vmem>>, vector<1x1x8x4xbf16>
    %49 = vector.shape_cast %48 : vector<1x1x8x4xbf16> to vector<8x4xbf16>
    %50 = vector.shape_cast %47 : vector<8x4xbf16> to vector<1x1x8x4xbf16>
    tpu.vector_store %arg5[%c0_39, %c2_40, %c0_41, %c0_42], %50 {strides = array<i32>} : memref<1x8x8x4xbf16, #tpu.memory_space<vmem>>, vector<1x1x8x4xbf16>,
    %51 = vector.extract_strided_slice %40 {offsets = [0, 8], sizes = [8, 4], strides = [1, 1]} : vector<8x12xf32> to vector<8x4xf32>
    %52 = arith.truncf %51 : vector<8x4xf32> to vector<8x4xbf16>
    %c0_43 = arith.constant 0 : index
    %c2_44 = arith.constant 2 : index
    %c0_45 = arith.constant 0 : index
    %c0_46 = arith.constant 0 : index
    %53 = vector.load %arg6[%c0_43, %c2_44, %c0_45, %c0_46] : memref<1x8x8x4xbf16, #tpu.memory_space<vmem>>, vector<1x1x8x4xbf16>
    %54 = vector.shape_cast %53 : vector<1x1x8x4xbf16> to vector<8x4xbf16>
    %55 = vector.shape_cast %52 : vector<8x4xbf16> to vector<1x1x8x4xbf16>
    tpu.vector_store %arg6[%c0_43, %c2_44, %c0_45, %c0_46], %55 {strides = array<i32>} : memref<1x8x8x4xbf16, #tpu.memory_space<vmem>>, vector<1x1x8x4xbf16>,
    %c3 = arith.constant 3 : index
    %c0_47 = arith.constant 0 : index
    %c0_48 = arith.constant 0 : index
    %56 = vector.load %arg3[%c3, %c0_47, %c0_48] : memref<8x32x12xbf16, #tpu.memory_space<vmem>>, vector<1x32x12xbf16>
    %57 = vector.shape_cast %56 : vector<1x32x12xbf16> to vector<32x12xbf16>
    %cst_49 = arith.constant dense<0.000000e+00> : vector<8x12xf32>
    %58 = tpu.matmul %1, %57, %cst_49 {dimension_numbers = #tpu.dot_dimension_numbers<[1], [0], [0], [1], [0, 0, 1, 1], [], []>} : vector<8x32xbf16>, vector<32x12xbf16>, vector<8x12xf32> -> vector<8x12xf32>
    %59 = vector.extract_strided_slice %58 {offsets = [0, 0], sizes = [8, 4], strides = [1, 1]} : vector<8x12xf32> to vector<8x4xf32>
    %60 = arith.truncf %59 : vector<8x4xf32> to vector<8x4xbf16>
    %c0_50 = arith.constant 0 : index
    %c3_51 = arith.constant 3 : index
    %c0_52 = arith.constant 0 : index
    %c0_53 = arith.constant 0 : index
    %61 = vector.load %arg4[%c0_50, %c3_51, %c0_52, %c0_53] : memref<1x8x8x4xbf16, #tpu.memory_space<vmem>>, vector<1x1x8x4xbf16>
    %62 = vector.shape_cast %61 : vector<1x1x8x4xbf16> to vector<8x4xbf16>
    %63 = vector.shape_cast %60 : vector<8x4xbf16> to vector<1x1x8x4xbf16>
    tpu.vector_store %arg4[%c0_50, %c3_51, %c0_52, %c0_53], %63 {strides = array<i32>} : memref<1x8x8x4xbf16, #tpu.memory_space<vmem>>, vector<1x1x8x4xbf16>,
    %64 = vector.extract_strided_slice %58 {offsets = [0, 4], sizes = [8, 4], strides = [1, 1]} : vector<8x12xf32> to vector<8x4xf32>
    %65 = arith.truncf %64 : vector<8x4xf32> to vector<8x4xbf16>
    %c0_54 = arith.constant 0 : index
    %c3_55 = arith.constant 3 : index
    %c0_56 = arith.constant 0 : index
    %c0_57 = arith.constant 0 : index
    %66 = vector.load %arg5[%c0_54, %c3_55, %c0_56, %c0_57] : memref<1x8x8x4xbf16, #tpu.memory_space<vmem>>, vector<1x1x8x4xbf16>
    %67 = vector.shape_cast %66 : vector<1x1x8x4xbf16> to vector<8x4xbf16>
    %68 = vector.shape_cast %65 : vector<8x4xbf16> to vector<1x1x8x4xbf16>
    tpu.vector_store %arg5[%c0_54, %c3_55, %c0_56, %c0_57], %68 {strides = array<i32>} : memref<1x8x8x4xbf16, #tpu.memory_space<vmem>>, vector<1x1x8x4xbf16>,
    %69 = vector.extract_strided_slice %58 {offsets = [0, 8], sizes = [8, 4], strides = [1, 1]} : vector<8x12xf32> to vector<8x4xf32>
    %70 = arith.truncf %69 : vector<8x4xf32> to vector<8x4xbf16>
    %c0_58 = arith.constant 0 : index
    %c3_59 = arith.constant 3 : index
    %c0_60 = arith.constant 0 : index
    %c0_61 = arith.constant 0 : index
    %71 = vector.load %arg6[%c0_58, %c3_59, %c0_60, %c0_61] : memref<1x8x8x4xbf16, #tpu.memory_space<vmem>>, vector<1x1x8x4xbf16>
    %72 = vector.shape_cast %71 : vector<1x1x8x4xbf16> to vector<8x4xbf16>
    %73 = vector.shape_cast %70 : vector<8x4xbf16> to vector<1x1x8x4xbf16>
    tpu.vector_store %arg6[%c0_58, %c3_59, %c0_60, %c0_61], %73 {strides = array<i32>} : memref<1x8x8x4xbf16, #tpu.memory_space<vmem>>, vector<1x1x8x4xbf16>,
    %c4 = arith.constant 4 : index
    %c0_62 = arith.constant 0 : index
    %c0_63 = arith.constant 0 : index
    %74 = vector.load %arg3[%c4, %c0_62, %c0_63] : memref<8x32x12xbf16, #tpu.memory_space<vmem>>, vector<1x32x12xbf16>
    %75 = vector.shape_cast %74 : vector<1x32x12xbf16> to vector<32x12xbf16>
    %cst_64 = arith.constant dense<0.000000e+00> : vector<8x12xf32>
    %76 = tpu.matmul %1, %75, %cst_64 {dimension_numbers = #tpu.dot_dimension_numbers<[1], [0], [0], [1], [0, 0, 1, 1], [], []>} : vector<8x32xbf16>, vector<32x12xbf16>, vector<8x12xf32> -> vector<8x12xf32>
    %77 = vector.extract_strided_slice %76 {offsets = [0, 0], sizes = [8, 4], strides = [1, 1]} : vector<8x12xf32> to vector<8x4xf32>
    %78 = arith.truncf %77 : vector<8x4xf32> to vector<8x4xbf16>
    %c0_65 = arith.constant 0 : index
    %c4_66 = arith.constant 4 : index
    %c0_67 = arith.constant 0 : index
    %c0_68 = arith.constant 0 : index
    %79 = vector.load %arg4[%c0_65, %c4_66, %c0_67, %c0_68] : memref<1x8x8x4xbf16, #tpu.memory_space<vmem>>, vector<1x1x8x4xbf16>
    %80 = vector.shape_cast %79 : vector<1x1x8x4xbf16> to vector<8x4xbf16>
    %81 = vector.shape_cast %78 : vector<8x4xbf16> to vector<1x1x8x4xbf16>
    tpu.vector_store %arg4[%c0_65, %c4_66, %c0_67, %c0_68], %81 {strides = array<i32>} : memref<1x8x8x4xbf16, #tpu.memory_space<vmem>>, vector<1x1x8x4xbf16>,
    %82 = vector.extract_strided_slice %76 {offsets = [0, 4], sizes = [8, 4], strides = [1, 1]} : vector<8x12xf32> to vector<8x4xf32>
    %83 = arith.truncf %82 : vector<8x4xf32> to vector<8x4xbf16>
    %c0_69 = arith.constant 0 : index
    %c4_70 = arith.constant 4 : index
    %c0_71 = arith.constant 0 : index
    %c0_72 = arith.constant 0 : index
    %84 = vector.load %arg5[%c0_69, %c4_70, %c0_71, %c0_72] : memref<1x8x8x4xbf16, #tpu.memory_space<vmem>>, vector<1x1x8x4xbf16>
    %85 = vector.shape_cast %84 : vector<1x1x8x4xbf16> to vector<8x4xbf16>
    %86 = vector.shape_cast %83 : vector<8x4xbf16> to vector<1x1x8x4xbf16>
    tpu.vector_store %arg5[%c0_69, %c4_70, %c0_71, %c0_72], %86 {strides = array<i32>} : memref<1x8x8x4xbf16, #tpu.memory_space<vmem>>, vector<1x1x8x4xbf16>,
    %87 = vector.extract_strided_slice %76 {offsets = [0, 8], sizes = [8, 4], strides = [1, 1]} : vector<8x12xf32> to vector<8x4xf32>
    %88 = arith.truncf %87 : vector<8x4xf32> to vector<8x4xbf16>
    %c0_73 = arith.constant 0 : index
    %c4_74 = arith.constant 4 : index
    %c0_75 = arith.constant 0 : index
    %c0_76 = arith.constant 0 : index
    %89 = vector.load %arg6[%c0_73, %c4_74, %c0_75, %c0_76] : memref<1x8x8x4xbf16, #tpu.memory_space<vmem>>, vector<1x1x8x4xbf16>
    %90 = vector.shape_cast %89 : vector<1x1x8x4xbf16> to vector<8x4xbf16>
    %91 = vector.shape_cast %88 : vector<8x4xbf16> to vector<1x1x8x4xbf16>
    tpu.vector_store %arg6[%c0_73, %c4_74, %c0_75, %c0_76], %91 {strides = array<i32>} : memref<1x8x8x4xbf16, #tpu.memory_space<vmem>>, vector<1x1x8x4xbf16>,
    %c5 = arith.constant 5 : index
    %c0_77 = arith.constant 0 : index
    %c0_78 = arith.constant 0 : index
    %92 = vector.load %arg3[%c5, %c0_77, %c0_78] : memref<8x32x12xbf16, #tpu.memory_space<vmem>>, vector<1x32x12xbf16>
    %93 = vector.shape_cast %92 : vector<1x32x12xbf16> to vector<32x12xbf16>
    %cst_79 = arith.constant dense<0.000000e+00> : vector<8x12xf32>
    %94 = tpu.matmul %1, %93, %cst_79 {dimension_numbers = #tpu.dot_dimension_numbers<[1], [0], [0], [1], [0, 0, 1, 1], [], []>} : vector<8x32xbf16>, vector<32x12xbf16>, vector<8x12xf32> -> vector<8x12xf32>
    %95 = vector.extract_strided_slice %94 {offsets = [0, 0], sizes = [8, 4], strides = [1, 1]} : vector<8x12xf32> to vector<8x4xf32>
    %96 = arith.truncf %95 : vector<8x4xf32> to vector<8x4xbf16>
    %c0_80 = arith.constant 0 : index
    %c5_81 = arith.constant 5 : index
    %c0_82 = arith.constant 0 : index
    %c0_83 = arith.constant 0 : index
    %97 = vector.load %arg4[%c0_80, %c5_81, %c0_82, %c0_83] : memref<1x8x8x4xbf16, #tpu.memory_space<vmem>>, vector<1x1x8x4xbf16>
    %98 = vector.shape_cast %97 : vector<1x1x8x4xbf16> to vector<8x4xbf16>
    %99 = vector.shape_cast %96 : vector<8x4xbf16> to vector<1x1x8x4xbf16>
    tpu.vector_store %arg4[%c0_80, %c5_81, %c0_82, %c0_83], %99 {strides = array<i32>} : memref<1x8x8x4xbf16, #tpu.memory_space<vmem>>, vector<1x1x8x4xbf16>,
    %100 = vector.extract_strided_slice %94 {offsets = [0, 4], sizes = [8, 4], strides = [1, 1]} : vector<8x12xf32> to vector<8x4xf32>
    %101 = arith.truncf %100 : vector<8x4xf32> to vector<8x4xbf16>
    %c0_84 = arith.constant 0 : index
    %c5_85 = arith.constant 5 : index
    %c0_86 = arith.constant 0 : index
    %c0_87 = arith.constant 0 : index
    %102 = vector.load %arg5[%c0_84, %c5_85, %c0_86, %c0_87] : memref<1x8x8x4xbf16, #tpu.memory_space<vmem>>, vector<1x1x8x4xbf16>
    %103 = vector.shape_cast %102 : vector<1x1x8x4xbf16> to vector<8x4xbf16>
    %104 = vector.shape_cast %101 : vector<8x4xbf16> to vector<1x1x8x4xbf16>
    tpu.vector_store %arg5[%c0_84, %c5_85, %c0_86, %c0_87], %104 {strides = array<i32>} : memref<1x8x8x4xbf16, #tpu.memory_space<vmem>>, vector<1x1x8x4xbf16>,
    %105 = vector.extract_strided_slice %94 {offsets = [0, 8], sizes = [8, 4], strides = [1, 1]} : vector<8x12xf32> to vector<8x4xf32>
    %106 = arith.truncf %105 : vector<8x4xf32> to vector<8x4xbf16>
    %c0_88 = arith.constant 0 : index
    %c5_89 = arith.constant 5 : index
    %c0_90 = arith.constant 0 : index
    %c0_91 = arith.constant 0 : index
    %107 = vector.load %arg6[%c0_88, %c5_89, %c0_90, %c0_91] : memref<1x8x8x4xbf16, #tpu.memory_space<vmem>>, vector<1x1x8x4xbf16>
    %108 = vector.shape_cast %107 : vector<1x1x8x4xbf16> to vector<8x4xbf16>
    %109 = vector.shape_cast %106 : vector<8x4xbf16> to vector<1x1x8x4xbf16>
    tpu.vector_store %arg6[%c0_88, %c5_89, %c0_90, %c0_91], %109 {strides = array<i32>} : memref<1x8x8x4xbf16, #tpu.memory_space<vmem>>, vector<1x1x8x4xbf16>,
    %c6 = arith.constant 6 : index
    %c0_92 = arith.constant 0 : index
    %c0_93 = arith.constant 0 : index
    %110 = vector.load %arg3[%c6, %c0_92, %c0_93] : memref<8x32x12xbf16, #tpu.memory_space<vmem>>, vector<1x32x12xbf16>
    %111 = vector.shape_cast %110 : vector<1x32x12xbf16> to vector<32x12xbf16>
    %cst_94 = arith.constant dense<0.000000e+00> : vector<8x12xf32>
    %112 = tpu.matmul %1, %111, %cst_94 {dimension_numbers = #tpu.dot_dimension_numbers<[1], [0], [0], [1], [0, 0, 1, 1], [], []>} : vector<8x32xbf16>, vector<32x12xbf16>, vector<8x12xf32> -> vector<8x12xf32>
    %113 = vector.extract_strided_slice %112 {offsets = [0, 0], sizes = [8, 4], strides = [1, 1]} : vector<8x12xf32> to vector<8x4xf32>
    %114 = arith.truncf %113 : vector<8x4xf32> to vector<8x4xbf16>
    %c0_95 = arith.constant 0 : index
    %c6_96 = arith.constant 6 : index
    %c0_97 = arith.constant 0 : index
    %c0_98 = arith.constant 0 : index
    %115 = vector.load %arg4[%c0_95, %c6_96, %c0_97, %c0_98] : memref<1x8x8x4xbf16, #tpu.memory_space<vmem>>, vector<1x1x8x4xbf16>
    %116 = vector.shape_cast %115 : vector<1x1x8x4xbf16> to vector<8x4xbf16>
    %117 = vector.shape_cast %114 : vector<8x4xbf16> to vector<1x1x8x4xbf16>
    tpu.vector_store %arg4[%c0_95, %c6_96, %c0_97, %c0_98], %117 {strides = array<i32>} : memref<1x8x8x4xbf16, #tpu.memory_space<vmem>>, vector<1x1x8x4xbf16>,
    %118 = vector.extract_strided_slice %112 {offsets = [0, 4], sizes = [8, 4], strides = [1, 1]} : vector<8x12xf32> to vector<8x4xf32>
    %119 = arith.truncf %118 : vector<8x4xf32> to vector<8x4xbf16>
    %c0_99 = arith.constant 0 : index
    %c6_100 = arith.constant 6 : index
    %c0_101 = arith.constant 0 : index
    %c0_102 = arith.constant 0 : index
    %120 = vector.load %arg5[%c0_99, %c6_100, %c0_101, %c0_102] : memref<1x8x8x4xbf16, #tpu.memory_space<vmem>>, vector<1x1x8x4xbf16>
    %121 = vector.shape_cast %120 : vector<1x1x8x4xbf16> to vector<8x4xbf16>
    %122 = vector.shape_cast %119 : vector<8x4xbf16> to vector<1x1x8x4xbf16>
    tpu.vector_store %arg5[%c0_99, %c6_100, %c0_101, %c0_102], %122 {strides = array<i32>} : memref<1x8x8x4xbf16, #tpu.memory_space<vmem>>, vector<1x1x8x4xbf16>,
    %123 = vector.extract_strided_slice %112 {offsets = [0, 8], sizes = [8, 4], strides = [1, 1]} : vector<8x12xf32> to vector<8x4xf32>
    %124 = arith.truncf %123 : vector<8x4xf32> to vector<8x4xbf16>
    %c0_103 = arith.constant 0 : index
    %c6_104 = arith.constant 6 : index
    %c0_105 = arith.constant 0 : index
    %c0_106 = arith.constant 0 : index
    %125 = vector.load %arg6[%c0_103, %c6_104, %c0_105, %c0_106] : memref<1x8x8x4xbf16, #tpu.memory_space<vmem>>, vector<1x1x8x4xbf16>
    %126 = vector.shape_cast %125 : vector<1x1x8x4xbf16> to vector<8x4xbf16>
    %127 = vector.shape_cast %124 : vector<8x4xbf16> to vector<1x1x8x4xbf16>
    tpu.vector_store %arg6[%c0_103, %c6_104, %c0_105, %c0_106], %127 {strides = array<i32>} : memref<1x8x8x4xbf16, #tpu.memory_space<vmem>>, vector<1x1x8x4xbf16>,
    %c7 = arith.constant 7 : index
    %c0_107 = arith.constant 0 : index
    %c0_108 = arith.constant 0 : index
    %128 = vector.load %arg3[%c7, %c0_107, %c0_108] : memref<8x32x12xbf16, #tpu.memory_space<vmem>>, vector<1x32x12xbf16>
    %129 = vector.shape_cast %128 : vector<1x32x12xbf16> to vector<32x12xbf16>
    %cst_109 = arith.constant dense<0.000000e+00> : vector<8x12xf32>
    %130 = tpu.matmul %1, %129, %cst_109 {dimension_numbers = #tpu.dot_dimension_numbers<[1], [0], [0], [1], [0, 0, 1, 1], [], []>} : vector<8x32xbf16>, vector<32x12xbf16>, vector<8x12xf32> -> vector<8x12xf32>
    %131 = vector.extract_strided_slice %130 {offsets = [0, 0], sizes = [8, 4], strides = [1, 1]} : vector<8x12xf32> to vector<8x4xf32>
    %132 = arith.truncf %131 : vector<8x4xf32> to vector<8x4xbf16>
    %c0_110 = arith.constant 0 : index
    %c7_111 = arith.constant 7 : index
    %c0_112 = arith.constant 0 : index
    %c0_113 = arith.constant 0 : index
    %133 = vector.load %arg4[%c0_110, %c7_111, %c0_112, %c0_113] : memref<1x8x8x4xbf16, #tpu.memory_space<vmem>>, vector<1x1x8x4xbf16>
    %134 = vector.shape_cast %133 : vector<1x1x8x4xbf16> to vector<8x4xbf16>
    %135 = vector.shape_cast %132 : vector<8x4xbf16> to vector<1x1x8x4xbf16>
    tpu.vector_store %arg4[%c0_110, %c7_111, %c0_112, %c0_113], %135 {strides = array<i32>} : memref<1x8x8x4xbf16, #tpu.memory_space<vmem>>, vector<1x1x8x4xbf16>,
    %136 = vector.extract_strided_slice %130 {offsets = [0, 4], sizes = [8, 4], strides = [1, 1]} : vector<8x12xf32> to vector<8x4xf32>
    %137 = arith.truncf %136 : vector<8x4xf32> to vector<8x4xbf16>
    %c0_114 = arith.constant 0 : index
    %c7_115 = arith.constant 7 : index
    %c0_116 = arith.constant 0 : index
    %c0_117 = arith.constant 0 : index
    %138 = vector.load %arg5[%c0_114, %c7_115, %c0_116, %c0_117] : memref<1x8x8x4xbf16, #tpu.memory_space<vmem>>, vector<1x1x8x4xbf16>
    %139 = vector.shape_cast %138 : vector<1x1x8x4xbf16> to vector<8x4xbf16>
    %140 = vector.shape_cast %137 : vector<8x4xbf16> to vector<1x1x8x4xbf16>
    tpu.vector_store %arg5[%c0_114, %c7_115, %c0_116, %c0_117], %140 {strides = array<i32>} : memref<1x8x8x4xbf16, #tpu.memory_space<vmem>>, vector<1x1x8x4xbf16>,
    %141 = vector.extract_strided_slice %130 {offsets = [0, 8], sizes = [8, 4], strides = [1, 1]} : vector<8x12xf32> to vector<8x4xf32>
    %142 = arith.truncf %141 : vector<8x4xf32> to vector<8x4xbf16>
    %c0_118 = arith.constant 0 : index
    %c7_119 = arith.constant 7 : index
    %c0_120 = arith.constant 0 : index
    %c0_121 = arith.constant 0 : index
    %143 = vector.load %arg6[%c0_118, %c7_119, %c0_120, %c0_121] : memref<1x8x8x4xbf16, #tpu.memory_space<vmem>>, vector<1x1x8x4xbf16>
    %144 = vector.shape_cast %143 : vector<1x1x8x4xbf16> to vector<8x4xbf16>
    %145 = vector.shape_cast %142 : vector<8x4xbf16> to vector<1x1x8x4xbf16>
    tpu.vector_store %arg6[%c0_118, %c7_119, %c0_120, %c0_121], %145 {strides = array<i32>} : memref<1x8x8x4xbf16, #tpu.memory_space<vmem>>, vector<1x1x8x4xbf16>,
    return
  }
  func.func @transform_0(%arg0: i32, %arg1: i32) -> (i32, i32, i32) {
    %c0_i32 = arith.constant 0 : i32
    %c0_i32_0 = arith.constant 0 : i32
    return %arg0, %arg1, %c0_i32 : i32, i32, i32
  }
  func.func @transform_1(%arg0: i32, %arg1: i32) -> (i32, i32, i32) {
    %c0_i32 = arith.constant 0 : i32
    %c0_i32_0 = arith.constant 0 : i32
    %c0_i32_1 = arith.constant 0 : i32
    %c0_i32_2 = arith.constant 0 : i32
    return %c0_i32, %c0_i32_0, %c0_i32_1 : i32, i32, i32
  }
  func.func @transform_2(%arg0: i32, %arg1: i32) -> (i32, i32, i32, i32) {
    %c0_i32 = arith.constant 0 : i32
    %c0_i32_0 = arith.constant 0 : i32
    %c0_i32_1 = arith.constant 0 : i32
    return %arg0, %c0_i32, %arg1, %c0_i32_0 : i32, i32, i32, i32
  }
  func.func @transform_3(%arg0: i32, %arg1: i32) -> (i32, i32, i32, i32) {
    %c0_i32 = arith.constant 0 : i32
    %c0_i32_0 = arith.constant 0 : i32
    %c0_i32_1 = arith.constant 0 : i32
    return %arg0, %c0_i32, %arg1, %c0_i32_0 : i32, i32, i32, i32
  }
  func.func @transform_4(%arg0: i32, %arg1: i32) -> (i32, i32, i32, i32) {
    %c0_i32 = arith.constant 0 : i32
    %c0_i32_0 = arith.constant 0 : i32
    %c0_i32_1 = arith.constant 0 : i32
    return %arg0, %c0_i32, %arg1, %c0_i32_0 : i32, i32, i32, i32
  }
}

module attributes {stable_mosaic.version = 11 : i64} {
  func.func @_qkv_proj_kernel(%arg0: i32, %arg1: i32, %arg2: memref<1x8x32xbf16, #tpu.memory_space<vmem>>, %arg3: memref<8x32x12xbf16, #tpu.memory_space<vmem>>, %arg4: memref<1x8x8x4xbf16, #tpu.memory_space<vmem>>, %arg5: memref<1x8x8x4xbf16, #tpu.memory_space<vmem>>, %arg6: memref<1x8x8x4xbf16, #tpu.memory_space<vmem>>) attributes {dimension_semantics = [#tpu.dimension_semantics<parallel>, #tpu.dimension_semantics<parallel>], iteration_bounds = array<i64: 2, 1>, scalar_prefetch = 0 : i64, scratch_operands = 0 : i64, tpu.core_type = #tpu.core_type<tc>, window_params = [{transform_indices = @transform_0, window_bounds = array<i64: 1, 8, 32>}, {pipeline_mode = #tpu.pipeline_mode<synchronous>, transform_indices = @transform_1, window_bounds = array<i64: 8, 32, 12>}, {transform_indices = @transform_2, window_bounds = array<i64: 1, 8, 8, 4>}, {transform_indices = @transform_3, window_bounds = array<i64: 1, 8, 8, 4>}, {transform_indices = @transform_4, window_bounds = array<i64: 1, 8, 8, 4>}]} {
    %c0 = arith.constant 0 : index
    %c0_0 = arith.constant 0 : index
    %c0_1 = arith.constant 0 : index
    %0 = vector.load %arg2[%c0, %c0_0, %c0_1] : memref<1x8x32xbf16, #tpu.memory_space<vmem>>, vector<1x8x32xbf16>
    %1 = vector.shape_cast %0 : vector<1x8x32xbf16> to vector<8x32xbf16>
    %c0_2 = arith.constant 0 : index
    %c0_3 = arith.constant 0 : index
    %c0_4 = arith.constant 0 : index
    %2 = vector.load %arg3[%c0_2, %c0_3, %c0_4] : memref<8x32x12xbf16, #tpu.memory_space<vmem>>, vector<1x32x12xbf16>
    %3 = vector.shape_cast %2 : vector<1x32x12xbf16> to vector<32x12xbf16>
    %cst = arith.constant dense<0.000000e+00> : vector<8x12xf32>
    %4 = tpu.matmul %1, %3, %cst {dimension_numbers = #tpu.dot_dimension_numbers<[1], [0], [0], [1], [0, 0, 1, 1], [], []>} : vector<8x32xbf16>, vector<32x12xbf16>, vector<8x12xf32> -> vector<8x12xf32>
    %5 = vector.extract_strided_slice %4 {offsets = [0, 0], sizes = [8, 4], strides = [1, 1]} : vector<8x12xf32> to vector<8x4xf32>
    %6 = arith.truncf %5 : vector<8x4xf32> to vector<8x4xbf16>
    %c0_5 = arith.constant 0 : index
    %c0_6 = arith.constant 0 : index
    %c0_7 = arith.constant 0 : index
    %c0_8 = arith.constant 0 : index
    %7 = vector.load %arg4[%c0_5, %c0_6, %c0_7, %c0_8] : memref<1x8x8x4xbf16, #tpu.memory_space<vmem>>, vector<1x1x8x4xbf16>
    %8 = vector.shape_cast %7 : vector<1x1x8x4xbf16> to vector<8x4xbf16>
    %9 = vector.shape_cast %6 : vector<8x4xbf16> to vector<1x1x8x4xbf16>
    tpu.vector_store %arg4[%c0_5, %c0_6, %c0_7, %c0_8], %9 {strides = array<i32>} : memref<1x8x8x4xbf16, #tpu.memory_space<vmem>>, vector<1x1x8x4xbf16>,
    %10 = vector.extract_strided_slice %4 {offsets = [0, 4], sizes = [8, 4], strides = [1, 1]} : vector<8x12xf32> to vector<8x4xf32>
    %11 = arith.truncf %10 : vector<8x4xf32> to vector<8x4xbf16>
    %c0_9 = arith.constant 0 : index
    %c0_10 = arith.constant 0 : index
    %c0_11 = arith.constant 0 : index
    %c0_12 = arith.constant 0 : index
    %12 = vector.load %arg5[%c0_9, %c0_10, %c0_11, %c0_12] : memref<1x8x8x4xbf16, #tpu.memory_space<vmem>>, vector<1x1x8x4xbf16>
    %13 = vector.shape_cast %12 : vector<1x1x8x4xbf16> to vector<8x4xbf16>
    %14 = vector.shape_cast %11 : vector<8x4xbf16> to vector<1x1x8x4xbf16>
    tpu.vector_store %arg5[%c0_9, %c0_10, %c0_11, %c0_12], %14 {strides = array<i32>} : memref<1x8x8x4xbf16, #tpu.memory_space<vmem>>, vector<1x1x8x4xbf16>,
    %15 = vector.extract_strided_slice %4 {offsets = [0, 8], sizes = [8, 4], strides = [1, 1]} : vector<8x12xf32> to vector<8x4xf32>
    %16 = arith.truncf %15 : vector<8x4xf32> to vector<8x4xbf16>
    %c0_13 = arith.constant 0 : index
    %c0_14 = arith.constant 0 : index
    %c0_15 = arith.constant 0 : index
    %c0_16 = arith.constant 0 : index
    %17 = vector.load %arg6[%c0_13, %c0_14, %c0_15, %c0_16] : memref<1x8x8x4xbf16, #tpu.memory_space<vmem>>, vector<1x1x8x4xbf16>
    %18 = vector.shape_cast %17 : vector<1x1x8x4xbf16> to vector<8x4xbf16>
    %19 = vector.shape_cast %16 : vector<8x4xbf16> to vector<1x1x8x4xbf16>
    tpu.vector_store %arg6[%c0_13, %c0_14, %c0_15, %c0_16], %19 {strides = array<i32>} : memref<1x8x8x4xbf16, #tpu.memory_space<vmem>>, vector<1x1x8x4xbf16>,
    %c1 = arith.constant 1 : index
    %c0_17 = arith.constant 0 : index
    %c0_18 = arith.constant 0 : index
    %20 = vector.load %arg3[%c1, %c0_17, %c0_18] : memref<8x32x12xbf16, #tpu.memory_space<vmem>>, vector<1x32x12xbf16>
    %21 = vector.shape_cast %20 : vector<1x32x12xbf16> to vector<32x12xbf16>
    %cst_19 = arith.constant dense<0.000000e+00> : vector<8x12xf32>
    %22 = tpu.matmul %1, %21, %cst_19 {dimension_numbers = #tpu.dot_dimension_numbers<[1], [0], [0], [1], [0, 0, 1, 1], [], []>} : vector<8x32xbf16>, vector<32x12xbf16>, vector<8x12xf32> -> vector<8x12xf32>
    %23 = vector.extract_strided_slice %22 {offsets = [0, 0], sizes = [8, 4], strides = [1, 1]} : vector<8x12xf32> to vector<8x4xf32>
    %24 = arith.truncf %23 : vector<8x4xf32> to vector<8x4xbf16>
    %c0_20 = arith.constant 0 : index
    %c1_21 = arith.constant 1 : index
    %c0_22 = arith.constant 0 : index
    %c0_23 = arith.constant 0 : index
    %25 = vector.load %arg4[%c0_20, %c1_21, %c0_22, %c0_23] : memref<1x8x8x4xbf16, #tpu.memory_space<vmem>>, vector<1x1x8x4xbf16>
    %26 = vector.shape_cast %25 : vector<1x1x8x4xbf16> to vector<8x4xbf16>
    %27 = vector.shape_cast %24 : vector<8x4xbf16> to vector<1x1x8x4xbf16>
    tpu.vector_store %arg4[%c0_20, %c1_21, %c0_22, %c0_23], %27 {strides = array<i32>} : memref<1x8x8x4xbf16, #tpu.memory_space<vmem>>, vector<1x1x8x4xbf16>,
    %28 = vector.extract_strided_slice %22 {offsets = [0, 4], sizes = [8, 4], strides = [1, 1]} : vector<8x12xf32> to vector<8x4xf32>
    %29 = arith.truncf %28 : vector<8x4xf32> to vector<8x4xbf16>
    %c0_24 = arith.constant 0 : index
    %c1_25 = arith.constant 1 : index
    %c0_26 = arith.constant 0 : index
    %c0_27 = arith.constant 0 : index
    %30 = vector.load %arg5[%c0_24, %c1_25, %c0_26, %c0_27] : memref<1x8x8x4xbf16, #tpu.memory_space<vmem>>, vector<1x1x8x4xbf16>
    %31 = vector.shape_cast %30 : vector<1x1x8x4xbf16> to vector<8x4xbf16>
    %32 = vector.shape_cast %29 : vector<8x4xbf16> to vector<1x1x8x4xbf16>
    tpu.vector_store %arg5[%c0_24, %c1_25, %c0_26, %c0_27], %32 {strides = array<i32>} : memref<1x8x8x4xbf16, #tpu.memory_space<vmem>>, vector<1x1x8x4xbf16>,
    %33 = vector.extract_strided_slice %22 {offsets = [0, 8], sizes = [8, 4], strides = [1, 1]} : vector<8x12xf32> to vector<8x4xf32>
    %34 = arith.truncf %33 : vector<8x4xf32> to vector<8x4xbf16>
    %c0_28 = arith.constant 0 : index
    %c1_29 = arith.constant 1 : index
    %c0_30 = arith.constant 0 : index
    %c0_31 = arith.constant 0 : index
    %35 = vector.load %arg6[%c0_28, %c1_29, %c0_30, %c0_31] : memref<1x8x8x4xbf16, #tpu.memory_space<vmem>>, vector<1x1x8x4xbf16>
    %36 = vector.shape_cast %35 : vector<1x1x8x4xbf16> to vector<8x4xbf16>
    %37 = vector.shape_cast %34 : vector<8x4xbf16> to vector<1x1x8x4xbf16>
    tpu.vector_store %arg6[%c0_28, %c1_29, %c0_30, %c0_31], %37 {strides = array<i32>} : memref<1x8x8x4xbf16, #tpu.memory_space<vmem>>, vector<1x1x8x4xbf16>,
    %c2 = arith.constant 2 : index
    %c0_32 = arith.constant 0 : index
    %c0_33 = arith.constant 0 : index
    %38 = vector.load %arg3[%c2, %c0_32, %c0_33] : memref<8x32x12xbf16, #tpu.memory_space<vmem>>, vector<1x32x12xbf16>
    %39 = vector.shape_cast %38 : vector<1x32x12xbf16> to vector<32x12xbf16>
    %cst_34 = arith.constant dense<0.000000e+00> : vector<8x12xf32>
    %40 = tpu.matmul %1, %39, %cst_34 {dimension_numbers = #tpu.dot_dimension_numbers<[1], [0], [0], [1], [0, 0, 1, 1], [], []>} : vector<8x32xbf16>, vector<32x12xbf16>, vector<8x12xf32> -> vector<8x12xf32>
    %41 = vector.extract_strided_slice %40 {offsets = [0, 0], sizes = [8, 4], strides = [1, 1]} : vector<8x12xf32> to vector<8x4xf32>
    %42 = arith.truncf %41 : vector<8x4xf32> to vector<8x4xbf16>
    %c0_35 = arith.constant 0 : index
    %c2_36 = arith.constant 2 : index
    %c0_37 = arith.constant 0 : index
    %c0_38 = arith.constant 0 : index
    %43 = vector.load %arg4[%c0_35, %c2_36, %c0_37, %c0_38] : memref<1x8x8x4xbf16, #tpu.memory_space<vmem>>, vector<1x1x8x4xbf16>
    %44 = vector.shape_cast %43 : vector<1x1x8x4xbf16> to vector<8x4xbf16>
    %45 = vector.shape_cast %42 : vector<8x4xbf16> to vector<1x1x8x4xbf16>
    tpu.vector_store %arg4[%c0_35, %c2_36, %c0_37, %c0_38], %45 {strides = array<i32>} : memref<1x8x8x4xbf16, #tpu.memory_space<vmem>>, vector<1x1x8x4xbf16>,
    %46 = vector.extract_strided_slice %40 {offsets = [0, 4], sizes = [8, 4], strides = [1, 1]} : vector<8x12xf32> to vector<8x4xf32>
    %47 = arith.truncf %46 : vector<8x4xf32> to vector<8x4xbf16>
    %c0_39 = arith.constant 0 : index
    %c2_40 = arith.constant 2 : index
    %c0_41 = arith.constant 0 : index
    %c0_42 = arith.constant 0 : index
    %48 = vector.load %arg5[%c0_39, %c2_40, %c0_41, %c0_42] : memref<1x8x8x4xbf16, #tpu.memory_space<vmem>>, vector<1x1x8x4xbf16>
    %49 = vector.shape_cast %48 : vector<1x1x8x4xbf16> to vector<8x4xbf16>
    %50 = vector.shape_cast %47 : vector<8x4xbf16> to vector<1x1x8x4xbf16>
    tpu.vector_store %arg5[%c0_39, %c2_40, %c0_41, %c0_42], %50 {strides = array<i32>} : memref<1x8x8x4xbf16, #tpu.memory_space<vmem>>, vector<1x1x8x4xbf16>,
    %51 = vector.extract_strided_slice %40 {offsets = [0, 8], sizes = [8, 4], strides = [1, 1]} : vector<8x12xf32> to vector<8x4xf32>
    %52 = arith.truncf %51 : vector<8x4xf32> to vector<8x4xbf16>
    %c0_43 = arith.constant 0 : index
    %c2_44 = arith.constant 2 : index
    %c0_45 = arith.constant 0 : index
    %c0_46 = arith.constant 0 : index
    %53 = vector.load %arg6[%c0_43, %c2_44, %c0_45, %c0_46] : memref<1x8x8x4xbf16, #tpu.memory_space<vmem>>, vector<1x1x8x4xbf16>
    %54 = vector.shape_cast %53 : vector<1x1x8x4xbf16> to vector<8x4xbf16>
    %55 = vector.shape_cast %52 : vector<8x4xbf16> to vector<1x1x8x4xbf16>
    tpu.vector_store %arg6[%c0_43, %c2_44, %c0_45, %c0_46], %55 {strides = array<i32>} : memref<1x8x8x4xbf16, #tpu.memory_space<vmem>>, vector<1x1x8x4xbf16>,
    %c3 = arith.constant 3 : index
    %c0_47 = arith.constant 0 : index
    %c0_48 = arith.constant 0 : index
    %56 = vector.load %arg3[%c3, %c0_47, %c0_48] : memref<8x32x12xbf16, #tpu.memory_space<vmem>>, vector<1x32x12xbf16>
    %57 = vector.shape_cast %56 : vector<1x32x12xbf16> to vector<32x12xbf16>
    %cst_49 = arith.constant dense<0.000000e+00> : vector<8x12xf32>
    %58 = tpu.matmul %1, %57, %cst_49 {dimension_numbers = #tpu.dot_dimension_numbers<[1], [0], [0], [1], [0, 0, 1, 1], [], []>} : vector<8x32xbf16>, vector<32x12xbf16>, vector<8x12xf32> -> vector<8x12xf32>
    %59 = vector.extract_strided_slice %58 {offsets = [0, 0], sizes = [8, 4], strides = [1, 1]} : vector<8x12xf32> to vector<8x4xf32>
    %60 = arith.truncf %59 : vector<8x4xf32> to vector<8x4xbf16>
    %c0_50 = arith.constant 0 : index
    %c3_51 = arith.constant 3 : index
    %c0_52 = arith.constant 0 : index
    %c0_53 = arith.constant 0 : index
    %61 = vector.load %arg4[%c0_50, %c3_51, %c0_52, %c0_53] : memref<1x8x8x4xbf16, #tpu.memory_space<vmem>>, vector<1x1x8x4xbf16>
    %62 = vector.shape_cast %61 : vector<1x1x8x4xbf16> to vector<8x4xbf16>
    %63 = vector.shape_cast %60 : vector<8x4xbf16> to vector<1x1x8x4xbf16>
    tpu.vector_store %arg4[%c0_50, %c3_51, %c0_52, %c0_53], %63 {strides = array<i32>} : memref<1x8x8x4xbf16, #tpu.memory_space<vmem>>, vector<1x1x8x4xbf16>,
    %64 = vector.extract_strided_slice %58 {offsets = [0, 4], sizes = [8, 4], strides = [1, 1]} : vector<8x12xf32> to vector<8x4xf32>
    %65 = arith.truncf %64 : vector<8x4xf32> to vector<8x4xbf16>
    %c0_54 = arith.constant 0 : index
    %c3_55 = arith.constant 3 : index
    %c0_56 = arith.constant 0 : index
    %c0_57 = arith.constant 0 : index
    %66 = vector.load %arg5[%c0_54, %c3_55, %c0_56, %c0_57] : memref<1x8x8x4xbf16, #tpu.memory_space<vmem>>, vector<1x1x8x4xbf16>
    %67 = vector.shape_cast %66 : vector<1x1x8x4xbf16> to vector<8x4xbf16>
    %68 = vector.shape_cast %65 : vector<8x4xbf16> to vector<1x1x8x4xbf16>
    tpu.vector_store %arg5[%c0_54, %c3_55, %c0_56, %c0_57], %68 {strides = array<i32>} : memref<1x8x8x4xbf16, #tpu.memory_space<vmem>>, vector<1x1x8x4xbf16>,
    %69 = vector.extract_strided_slice %58 {offsets = [0, 8], sizes = [8, 4], strides = [1, 1]} : vector<8x12xf32> to vector<8x4xf32>
    %70 = arith.truncf %69 : vector<8x4xf32> to vector<8x4xbf16>
    %c0_58 = arith.constant 0 : index
    %c3_59 = arith.constant 3 : index
    %c0_60 = arith.constant 0 : index
    %c0_61 = arith.constant 0 : index
    %71 = vector.load %arg6[%c0_58, %c3_59, %c0_60, %c0_61] : memref<1x8x8x4xbf16, #tpu.memory_space<vmem>>, vector<1x1x8x4xbf16>
    %72 = vector.shape_cast %71 : vector<1x1x8x4xbf16> to vector<8x4xbf16>
    %73 = vector.shape_cast %70 : vector<8x4xbf16> to vector<1x1x8x4xbf16>
    tpu.vector_store %arg6[%c0_58, %c3_59, %c0_60, %c0_61], %73 {strides = array<i32>} : memref<1x8x8x4xbf16, #tpu.memory_space<vmem>>, vector<1x1x8x4xbf16>,
    %c4 = arith.constant 4 : index
    %c0_62 = arith.constant 0 : index
    %c0_63 = arith.constant 0 : index
    %74 = vector.load %arg3[%c4, %c0_62, %c0_63] : memref<8x32x12xbf16, #tpu.memory_space<vmem>>, vector<1x32x12xbf16>
    %75 = vector.shape_cast %74 : vector<1x32x12xbf16> to vector<32x12xbf16>
    %cst_64 = arith.constant dense<0.000000e+00> : vector<8x12xf32>
    %76 = tpu.matmul %1, %75, %cst_64 {dimension_numbers = #tpu.dot_dimension_numbers<[1], [0], [0], [1], [0, 0, 1, 1], [], []>} : vector<8x32xbf16>, vector<32x12xbf16>, vector<8x12xf32> -> vector<8x12xf32>
    %77 = vector.extract_strided_slice %76 {offsets = [0, 0], sizes = [8, 4], strides = [1, 1]} : vector<8x12xf32> to vector<8x4xf32>
    %78 = arith.truncf %77 : vector<8x4xf32> to vector<8x4xbf16>
    %c0_65 = arith.constant 0 : index
    %c4_66 = arith.constant 4 : index
    %c0_67 = arith.constant 0 : index
    %c0_68 = arith.constant 0 : index
    %79 = vector.load %arg4[%c0_65, %c4_66, %c0_67, %c0_68] : memref<1x8x8x4xbf16, #tpu.memory_space<vmem>>, vector<1x1x8x4xbf16>
    %80 = vector.shape_cast %79 : vector<1x1x8x4xbf16> to vector<8x4xbf16>
    %81 = vector.shape_cast %78 : vector<8x4xbf16> to vector<1x1x8x4xbf16>
    tpu.vector_store %arg4[%c0_65, %c4_66, %c0_67, %c0_68], %81 {strides = array<i32>} : memref<1x8x8x4xbf16, #tpu.memory_space<vmem>>, vector<1x1x8x4xbf16>,
    %82 = vector.extract_strided_slice %76 {offsets = [0, 4], sizes = [8, 4], strides = [1, 1]} : vector<8x12xf32> to vector<8x4xf32>
    %83 = arith.truncf %82 : vector<8x4xf32> to vector<8x4xbf16>
    %c0_69 = arith.constant 0 : index
    %c4_70 = arith.constant 4 : index
    %c0_71 = arith.constant 0 : index
    %c0_72 = arith.constant 0 : index
    %84 = vector.load %arg5[%c0_69, %c4_70, %c0_71, %c0_72] : memref<1x8x8x4xbf16, #tpu.memory_space<vmem>>, vector<1x1x8x4xbf16>
    %85 = vector.shape_cast %84 : vector<1x1x8x4xbf16> to vector<8x4xbf16>
    %86 = vector.shape_cast %83 : vector<8x4xbf16> to vector<1x1x8x4xbf16>
    tpu.vector_store %arg5[%c0_69, %c4_70, %c0_71, %c0_72], %86 {strides = array<i32>} : memref<1x8x8x4xbf16, #tpu.memory_space<vmem>>, vector<1x1x8x4xbf16>,
    %87 = vector.extract_strided_slice %76 {offsets = [0, 8], sizes = [8, 4], strides = [1, 1]} : vector<8x12xf32> to vector<8x4xf32>
    %88 = arith.truncf %87 : vector<8x4xf32> to vector<8x4xbf16>
    %c0_73 = arith.constant 0 : index
    %c4_74 = arith.constant 4 : index
    %c0_75 = arith.constant 0 : index
    %c0_76 = arith.constant 0 : index
    %89 = vector.load %arg6[%c0_73, %c4_74, %c0_75, %c0_76] : memref<1x8x8x4xbf16, #tpu.memory_space<vmem>>, vector<1x1x8x4xbf16>
    %90 = vector.shape_cast %89 : vector<1x1x8x4xbf16> to vector<8x4xbf16>
    %91 = vector.shape_cast %88 : vector<8x4xbf16> to vector<1x1x8x4xbf16>
    tpu.vector_store %arg6[%c0_73, %c4_74, %c0_75, %c0_76], %91 {strides = array<i32>} : memref<1x8x8x4xbf16, #tpu.memory_space<vmem>>, vector<1x1x8x4xbf16>,
    %c5 = arith.constant 5 : index
    %c0_77 = arith.constant 0 : index
    %c0_78 = arith.constant 0 : index
    %92 = vector.load %arg3[%c5, %c0_77, %c0_78] : memref<8x32x12xbf16, #tpu.memory_space<vmem>>, vector<1x32x12xbf16>
    %93 = vector.shape_cast %92 : vector<1x32x12xbf16> to vector<32x12xbf16>
    %cst_79 = arith.constant dense<0.000000e+00> : vector<8x12xf32>
    %94 = tpu.matmul %1, %93, %cst_79 {dimension_numbers = #tpu.dot_dimension_numbers<[1], [0], [0], [1], [0, 0, 1, 1], [], []>} : vector<8x32xbf16>, vector<32x12xbf16>, vector<8x12xf32> -> vector<8x12xf32>
    %95 = vector.extract_strided_slice %94 {offsets = [0, 0], sizes = [8, 4], strides = [1, 1]} : vector<8x12xf32> to vector<8x4xf32>
    %96 = arith.truncf %95 : vector<8x4xf32> to vector<8x4xbf16>
    %c0_80 = arith.constant 0 : index
    %c5_81 = arith.constant 5 : index
    %c0_82 = arith.constant 0 : index
    %c0_83 = arith.constant 0 : index
    %97 = vector.load %arg4[%c0_80, %c5_81, %c0_82, %c0_83] : memref<1x8x8x4xbf16, #tpu.memory_space<vmem>>, vector<1x1x8x4xbf16>
    %98 = vector.shape_cast %97 : vector<1x1x8x4xbf16> to vector<8x4xbf16>
    %99 = vector.shape_cast %96 : vector<8x4xbf16> to vector<1x1x8x4xbf16>
    tpu.vector_store %arg4[%c0_80, %c5_81, %c0_82, %c0_83], %99 {strides = array<i32>} : memref<1x8x8x4xbf16, #tpu.memory_space<vmem>>, vector<1x1x8x4xbf16>,
    %100 = vector.extract_strided_slice %94 {offsets = [0, 4], sizes = [8, 4], strides = [1, 1]} : vector<8x12xf32> to vector<8x4xf32>
    %101 = arith.truncf %100 : vector<8x4xf32> to vector<8x4xbf16>
    %c0_84 = arith.constant 0 : index
    %c5_85 = arith.constant 5 : index
    %c0_86 = arith.constant 0 : index
    %c0_87 = arith.constant 0 : index
    %102 = vector.load %arg5[%c0_84, %c5_85, %c0_86, %c0_87] : memref<1x8x8x4xbf16, #tpu.memory_space<vmem>>, vector<1x1x8x4xbf16>
    %103 = vector.shape_cast %102 : vector<1x1x8x4xbf16> to vector<8x4xbf16>
    %104 = vector.shape_cast %101 : vector<8x4xbf16> to vector<1x1x8x4xbf16>
    tpu.vector_store %arg5[%c0_84, %c5_85, %c0_86, %c0_87], %104 {strides = array<i32>} : memref<1x8x8x4xbf16, #tpu.memory_space<vmem>>, vector<1x1x8x4xbf16>,
    %105 = vector.extract_strided_slice %94 {offsets = [0, 8], sizes = [8, 4], strides = [1, 1]} : vector<8x12xf32> to vector<8x4xf32>
    %106 = arith.truncf %105 : vector<8x4xf32> to vector<8x4xbf16>
    %c0_88 = arith.constant 0 : index
    %c5_89 = arith.constant 5 : index
    %c0_90 = arith.constant 0 : index
    %c0_91 = arith.constant 0 : index
    %107 = vector.load %arg6[%c0_88, %c5_89, %c0_90, %c0_91] : memref<1x8x8x4xbf16, #tpu.memory_space<vmem>>, vector<1x1x8x4xbf16>
    %108 = vector.shape_cast %107 : vector<1x1x8x4xbf16> to vector<8x4xbf16>
    %109 = vector.shape_cast %106 : vector<8x4xbf16> to vector<1x1x8x4xbf16>
    tpu.vector_store %arg6[%c0_88, %c5_89, %c0_90, %c0_91], %109 {strides = array<i32>} : memref<1x8x8x4xbf16, #tpu.memory_space<vmem>>, vector<1x1x8x4xbf16>,
    %c6 = arith.constant 6 : index
    %c0_92 = arith.constant 0 : index
    %c0_93 = arith.constant 0 : index
    %110 = vector.load %arg3[%c6, %c0_92, %c0_93] : memref<8x32x12xbf16, #tpu.memory_space<vmem>>, vector<1x32x12xbf16>
    %111 = vector.shape_cast %110 : vector<1x32x12xbf16> to vector<32x12xbf16>
    %cst_94 = arith.constant dense<0.000000e+00> : vector<8x12xf32>
    %112 = tpu.matmul %1, %111, %cst_94 {dimension_numbers = #tpu.dot_dimension_numbers<[1], [0], [0], [1], [0, 0, 1, 1], [], []>} : vector<8x32xbf16>, vector<32x12xbf16>, vector<8x12xf32> -> vector<8x12xf32>
    %113 = vector.extract_strided_slice %112 {offsets = [0, 0], sizes = [8, 4], strides = [1, 1]} : vector<8x12xf32> to vector<8x4xf32>
    %114 = arith.truncf %113 : vector<8x4xf32> to vector<8x4xbf16>
    %c0_95 = arith.constant 0 : index
    %c6_96 = arith.constant 6 : index
    %c0_97 = arith.constant 0 : index
    %c0_98 = arith.constant 0 : index
    %115 = vector.load %arg4[%c0_95, %c6_96, %c0_97, %c0_98] : memref<1x8x8x4xbf16, #tpu.memory_space<vmem>>, vector<1x1x8x4xbf16>
    %116 = vector.shape_cast %115 : vector<1x1x8x4xbf16> to vector<8x4xbf16>
    %117 = vector.shape_cast %114 : vector<8x4xbf16> to vector<1x1x8x4xbf16>
    tpu.vector_store %arg4[%c0_95, %c6_96, %c0_97, %c0_98], %117 {strides = array<i32>} : memref<1x8x8x4xbf16, #tpu.memory_space<vmem>>, vector<1x1x8x4xbf16>,
    %118 = vector.extract_strided_slice %112 {offsets = [0, 4], sizes = [8, 4], strides = [1, 1]} : vector<8x12xf32> to vector<8x4xf32>
    %119 = arith.truncf %118 : vector<8x4xf32> to vector<8x4xbf16>
    %c0_99 = arith.constant 0 : index
    %c6_100 = arith.constant 6 : index
    %c0_101 = arith.constant 0 : index
    %c0_102 = arith.constant 0 : index
    %120 = vector.load %arg5[%c0_99, %c6_100, %c0_101, %c0_102] : memref<1x8x8x4xbf16, #tpu.memory_space<vmem>>, vector<1x1x8x4xbf16>
    %121 = vector.shape_cast %120 : vector<1x1x8x4xbf16> to vector<8x4xbf16>
    %122 = vector.shape_cast %119 : vector<8x4xbf16> to vector<1x1x8x4xbf16>
    tpu.vector_store %arg5[%c0_99, %c6_100, %c0_101, %c0_102], %122 {strides = array<i32>} : memref<1x8x8x4xbf16, #tpu.memory_space<vmem>>, vector<1x1x8x4xbf16>,
    %123 = vector.extract_strided_slice %112 {offsets = [0, 8], sizes = [8, 4], strides = [1, 1]} : vector<8x12xf32> to vector<8x4xf32>
    %124 = arith.truncf %123 : vector<8x4xf32> to vector<8x4xbf16>
    %c0_103 = arith.constant 0 : index
    %c6_104 = arith.constant 6 : index
    %c0_105 = arith.constant 0 : index
    %c0_106 = arith.constant 0 : index
    %125 = vector.load %arg6[%c0_103, %c6_104, %c0_105, %c0_106] : memref<1x8x8x4xbf16, #tpu.memory_space<vmem>>, vector<1x1x8x4xbf16>
    %126 = vector.shape_cast %125 : vector<1x1x8x4xbf16> to vector<8x4xbf16>
    %127 = vector.shape_cast %124 : vector<8x4xbf16> to vector<1x1x8x4xbf16>
    tpu.vector_store %arg6[%c0_103, %c6_104, %c0_105, %c0_106], %127 {strides = array<i32>} : memref<1x8x8x4xbf16, #tpu.memory_space<vmem>>, vector<1x1x8x4xbf16>,
    %c7 = arith.constant 7 : index
    %c0_107 = arith.constant 0 : index
    %c0_108 = arith.constant 0 : index
    %128 = vector.load %arg3[%c7, %c0_107, %c0_108] : memref<8x32x12xbf16, #tpu.memory_space<vmem>>, vector<1x32x12xbf16>
    %129 = vector.shape_cast %128 : vector<1x32x12xbf16> to vector<32x12xbf16>
    %cst_109 = arith.constant dense<0.000000e+00> : vector<8x12xf32>
    %130 = tpu.matmul %1, %129, %cst_109 {dimension_numbers = #tpu.dot_dimension_numbers<[1], [0], [0], [1], [0, 0, 1, 1], [], []>} : vector<8x32xbf16>, vector<32x12xbf16>, vector<8x12xf32> -> vector<8x12xf32>
    %131 = vector.extract_strided_slice %130 {offsets = [0, 0], sizes = [8, 4], strides = [1, 1]} : vector<8x12xf32> to vector<8x4xf32>
    %132 = arith.truncf %131 : vector<8x4xf32> to vector<8x4xbf16>
    %c0_110 = arith.constant 0 : index
    %c7_111 = arith.constant 7 : index
    %c0_112 = arith.constant 0 : index
    %c0_113 = arith.constant 0 : index
    %133 = vector.load %arg4[%c0_110, %c7_111, %c0_112, %c0_113] : memref<1x8x8x4xbf16, #tpu.memory_space<vmem>>, vector<1x1x8x4xbf16>
    %134 = vector.shape_cast %133 : vector<1x1x8x4xbf16> to vector<8x4xbf16>
    %135 = vector.shape_cast %132 : vector<8x4xbf16> to vector<1x1x8x4xbf16>
    tpu.vector_store %arg4[%c0_110, %c7_111, %c0_112, %c0_113], %135 {strides = array<i32>} : memref<1x8x8x4xbf16, #tpu.memory_space<vmem>>, vector<1x1x8x4xbf16>,
    %136 = vector.extract_strided_slice %130 {offsets = [0, 4], sizes = [8, 4], strides = [1, 1]} : vector<8x12xf32> to vector<8x4xf32>
    %137 = arith.truncf %136 : vector<8x4xf32> to vector<8x4xbf16>
    %c0_114 = arith.constant 0 : index
    %c7_115 = arith.constant 7 : index
    %c0_116 = arith.constant 0 : index
    %c0_117 = arith.constant 0 : index
    %138 = vector.load %arg5[%c0_114, %c7_115, %c0_116, %c0_117] : memref<1x8x8x4xbf16, #tpu.memory_space<vmem>>, vector<1x1x8x4xbf16>
    %139 = vector.shape_cast %138 : vector<1x1x8x4xbf16> to vector<8x4xbf16>
    %140 = vector.shape_cast %137 : vector<8x4xbf16> to vector<1x1x8x4xbf16>
    tpu.vector_store %arg5[%c0_114, %c7_115, %c0_116, %c0_117], %140 {strides = array<i32>} : memref<1x8x8x4xbf16, #tpu.memory_space<vmem>>, vector<1x1x8x4xbf16>,
    %141 = vector.extract_strided_slice %130 {offsets = [0, 8], sizes = [8, 4], strides = [1, 1]} : vector<8x12xf32> to vector<8x4xf32>
    %142 = arith.truncf %141 : vector<8x4xf32> to vector<8x4xbf16>
    %c0_118 = arith.constant 0 : index
    %c7_119 = arith.constant 7 : index
    %c0_120 = arith.constant 0 : index
    %c0_121 = arith.constant 0 : index
    %143 = vector.load %arg6[%c0_118, %c7_119, %c0_120, %c0_121] : memref<1x8x8x4xbf16, #tpu.memory_space<vmem>>, vector<1x1x8x4xbf16>
    %144 = vector.shape_cast %143 : vector<1x1x8x4xbf16> to vector<8x4xbf16>
    %145 = vector.shape_cast %142 : vector<8x4xbf16> to vector<1x1x8x4xbf16>
    tpu.vector_store %arg6[%c0_118, %c7_119, %c0_120, %c0_121], %145 {strides = array<i32>} : memref<1x8x8x4xbf16, #tpu.memory_space<vmem>>, vector<1x1x8x4xbf16>,
    return
  }
  func.func @transform_0(%arg0: i32, %arg1: i32) -> (i32, i32, i32) {
    %c0_i32 = arith.constant 0 : i32
    %c0_i32_0 = arith.constant 0 : i32
    return %arg0, %arg1, %c0_i32 : i32, i32, i32
  }
  func.func @transform_1(%arg0: i32, %arg1: i32) -> (i32, i32, i32) {
    %c0_i32 = arith.constant 0 : i32
    %c0_i32_0 = arith.constant 0 : i32
    %c0_i32_1 = arith.constant 0 : i32
    %c0_i32_2 = arith.constant 0 : i32
    return %c0_i32, %c0_i32_0, %c0_i32_1 : i32, i32, i32
  }
  func.func @transform_2(%arg0: i32, %arg1: i32) -> (i32, i32, i32, i32) {
    %c0_i32 = arith.constant 0 : i32
    %c0_i32_0 = arith.constant 0 : i32
    %c0_i32_1 = arith.constant 0 : i32
    return %arg0, %c0_i32, %arg1, %c0_i32_0 : i32, i32, i32, i32
  }
  func.func @transform_3(%arg0: i32, %arg1: i32) -> (i32, i32, i32, i32) {
    %c0_i32 = arith.constant 0 : i32
    %c0_i32_0 = arith.constant 0 : i32
    %c0_i32_1 = arith.constant 0 : i32
    return %arg0, %c0_i32, %arg1, %c0_i32_0 : i32, i32, i32, i32
  }
  func.func @transform_4(%arg0: i32, %arg1: i32) -> (i32, i32, i32, i32) {
    %c0_i32 = arith.constant 0 : i32
    %c0_i32_0 = arith.constant 0 : i32
    %c0_i32_1 = arith.constant 0 : i32
    return %arg0, %c0_i32, %arg1, %c0_i32_0 : i32, i32, i32, i32
  }
}

</mosaic_0001>

<bundles_post_ra>
// kernel: tpu_custom_call.1
= control target key start
LH: loop header
LB: loop body
LE: loop exit
PB: predicated region body
PF: predicated region fallthrough
CT: control target
= control target key end

     0   :  { %s1319_s15 = smov 0   ;;  %s1321_s16 = smov 0   ;;  %s1515_s0 = inlined_call_operand.vmem [shape: bf16[2,8,32], index: 0, kind: input, shape index: {}]   ;;  %s1516_s1 = inlined_call_operand.vmem [shape: bf16[8,32,12], index: 1, kind: input, shape index: {}]   ;;  %s1517_s2 = inlined_call_operand.vmem [shape: bf16[2,8,8,4], index: 2, kind: output, shape index: {0}]   ;;  %s1518_s3 = inlined_call_operand.vmem [shape: bf16[2,8,8,4], index: 3, kind: output, shape index: {1}]   ;;  %s1519_s4 = inlined_call_operand.vmem [shape: bf16[2,8,8,4], index: 4, kind: output, shape index: {2}]  }
   0x1   :  { %s1323_s17 = smov 0  }
   0x2 LB: > { %s27_s18 = sadd.s32 1, %s1284_s16  ;;  %p1032_p0 = scmp.ge.s32.totalorder %s1288_s17, 1  ;;  %s1288_s17 = sphi %s1323_s17, %s15_s17   ;;  %s1284_s16 = sphi %s1321_s16, %s1521_s16   ;;  %s1280_s15 = sphi %s1319_s15, %s1520_s15  }
   0x3   : > { %p29_p1 = scmp.ge.s32.totalorder %s27_s18, 2  ;;  %p189_p2 = scmp.lt.s32.totalorder %s1288_s17, 3 }
   0x5   : > { %s1523_s18 = smov (%p29_p1, %s27_s18), 0  ;;  %p190_p3 = pnand %p1032_p0, %p189_p2 }
   0x6   : > { %p236_p4 = scmp.lt.s32.totalorder (!%p190_p3), %s1280_s15, 1  ;;  %s1292_s11 = smov (!%p190_p3), 124  }
   0x7   : > { %193 = sbr.rel (%p190_p3) target bundleno = 361 (0x169), region = 28 }
   0xc   : > { %v1250_v0 = vld [vmem:[%s1516_s1 + $0x8] sm:$0xff]   ;;  %v1290_v1 = vmov 0.0   ;;  %v1251_v2 = vld [vmem:[%s1516_s1 + $0x18] sm:$0xff]   ;;  %v1252_v3 = vld [vmem:[%s1516_s1] sm:$0xff]   ;;  %vm1291_vm0 = vmmov 0   ;;  %s1525_s15 = smov (!%p236_p4, %s1280_s15), 1 }
   0xd   : > { %1158 = vmatprep.subr.bf16.mxu0 %v1290_v1  ;;  %1166 = vmatprep.subr.bf16.mxu1 %v1290_v1  ;;  %v1253_v4 = vld [vmem:[%s1516_s1 + $0x10] sm:$0xff]   ;;  %vm285_vm1 = vcmask 261120   ;;  %s1033_s27 = sshll.u32 %s1525_s15, 2  ;;  %v1254_v5 = vld [vmem:[%s1516_s1 + $0x28] sm:$0xff]   ;;  %v1255_v6 = vld [vmem:[%s1516_s1 + $0x38] sm:$0xff]   ;;  %s1432_s7 = sshll.u32 %s1525_s15, 5 }
   0xe   : > { %1159 = vmatpush3.bf16.msra.mxu0 %v1250_v0  ;;  %1162 = vmatprep.mubr.msk.bf16.mxu0 %vm1291_vm0, %v1290_v1  ;;  %s242_s6 = scalar_lea.vmem %s1515_s0, %s1033_s27  ;;  %v1256_v8 = vld [vmem:[%s1516_s1 + $0x20] sm:$0xff]   ;;  %v1257_v9 = vld [vmem:[%s1516_s1 + $0x30] sm:$0xff]   ;;  %v1258_v10 = vld [vmem:[%s1516_s1 + $0x48] sm:$0xff]   ;;  %s1438_s10 = scalar_lea.vmem %s1517_s2, %s1432_s7  ;;  %vm330_vm2 = vcmask 27648  }
   0xf   : > { %1167 = vmatpush3.bf16.msra.mxu1 %v1251_v2  ;;  %1160 = vmatprep.subr.bf16.mxu0 %v1290_v1  ;;  %v268_v7 = vld [vmem:[%s242_s6] sm:$0xf]  ;;  %v1259_v11 = vld [vmem:[%s1516_s1 + $0x58] sm:$0xff]   ;;  %v1261_v13 = vld [vmem:[%s1516_s1 + $0x50] sm:$0xff]   ;;  %s1293_s15 = smov 120   ;;  %s1476_s14 = scalar_lea.vmem %s1518_s3, %s1432_s7 }
  0x10   : > { %1168 = vmatprep.subr.bf16.mxu1 %v1290_v1  ;;  %1170 = vmatprep.mubr.msk.bf16.mxu1 %vm1291_vm0, %v1290_v1  ;;  %v1260_v12 = vld [vmem:[%s1516_s1 + $0x40] sm:$0xff]   ;;  %v1262_v14 = vld [vmem:[%s1516_s1 + $0x68] sm:$0xff]   ;;  %v1263_v15 = vld [vmem:[%s1516_s1 + $0x78] sm:$0xff]   ;;  %s266_s21 = scalar_lea.vmem %s1519_s4, %s1432_s7 }
  0x11   : > { %v1264_v16 = vld [vmem:[%s1516_s1 + $0x60] sm:$0xff]   ;;  %v1265_v17 = vld [vmem:[%s1516_s1 + $0x70] sm:$0xff]  }
  0x12   : > { %1161 = vmatpush3.bf16.msra.mxu0 %v1252_v3 }
  0x13   : > { %1169 = vmatpush3.bf16.msra.mxu1 %v1253_v4  ;;  %1174 = vmatprep.subr.bf16.mxu0 %v1290_v1 }
  0x14   : > { %1182 = vmatprep.subr.bf16.mxu1 %v1290_v1 }
  0x15   : > { %1163 = vmatmul.mubr.msk.bf16.vlgmr.msra.gmra.mxu0 %vm285_vm1, %v268_v7 }
  0x16   : > { %1171 = vmatmul.mubr.msk.bf16.vlgmr.msra.gmra.mxu1 %vm285_vm1, %v268_v7  ;;  %1175 = vmatpush3.bf16.msra.mxu0 %v1254_v5 }
  0x17   : > { %1183 = vmatpush3.bf16.msra.mxu1 %v1255_v6  ;;  %1176 = vmatprep.subr.bf16.mxu0 %v1290_v1 }
  0x18   : > { %1184 = vmatprep.subr.bf16.mxu1 %v1290_v1  ;;  %1178 = vmatprep.mubr.msk.bf16.mxu0 %vm1291_vm0, %v1290_v1 }
  0x19   : > { %1186 = vmatprep.mubr.msk.bf16.mxu1 %vm1291_vm0, %v1290_v1 }
  0x1a   : > { %1177 = vmatpush3.bf16.msra.mxu0 %v1256_v8 }
  0x1b   : > { %1185 = vmatpush3.bf16.msra.mxu1 %v1257_v9  ;;  %1190 = vmatprep.subr.bf16.mxu0 %v1290_v1 }
  0x1c   : > { %1198 = vmatprep.subr.bf16.mxu1 %v1290_v1 }
  0x1d   : > { %1179 = vmatmul.mubr.msk.bf16.vlgmr.msra.gmra.mxu0 %vm285_vm1, %v268_v7 }
  0x1e   : > { %1187 = vmatmul.mubr.msk.bf16.vlgmr.msra.gmra.mxu1 %vm285_vm1, %v268_v7  ;;  %1191 = vmatpush3.bf16.msra.mxu0 %v1258_v10 }
  0x1f   : > { %1199 = vmatpush3.bf16.msra.mxu1 %v1259_v11  ;;  %1192 = vmatprep.subr.bf16.mxu0 %v1290_v1 }
  0x20   : > { %1200 = vmatprep.subr.bf16.mxu1 %v1290_v1  ;;  %1194 = vmatprep.mubr.msk.bf16.mxu0 %vm1291_vm0, %v1290_v1 }
  0x21   : > { %1202 = vmatprep.mubr.msk.bf16.mxu1 %vm1291_vm0, %v1290_v1 }
  0x22   : > { %1193 = vmatpush3.bf16.msra.mxu0 %v1260_v12 }
  0x23   : > { %1201 = vmatpush3.bf16.msra.mxu1 %v1261_v13  ;;  %1206 = vmatprep.subr.bf16.mxu0 %v1290_v1 }
  0x24   : > { %1214 = vmatprep.subr.bf16.mxu1 %v1290_v1 }
  0x25   : > { %1195 = vmatmul.mubr.msk.bf16.vlgmr.msra.gmra.mxu0 %vm285_vm1, %v268_v7 }
  0x26   : > { %1203 = vmatmul.mubr.msk.bf16.vlgmr.msra.gmra.mxu1 %vm285_vm1, %v268_v7  ;;  %1207 = vmatpush3.bf16.msra.mxu0 %v1262_v14 }
  0x27   : > { %1215 = vmatpush3.bf16.msra.mxu1 %v1263_v15  ;;  %1208 = vmatprep.subr.bf16.mxu0 %v1290_v1 }
  0x28   : > { %1216 = vmatprep.subr.bf16.mxu1 %v1290_v1  ;;  %1210 = vmatprep.mubr.msk.bf16.mxu0 %vm1291_vm0, %v1290_v1 }
  0x29   : > { %1218 = vmatprep.mubr.msk.bf16.mxu1 %vm1291_vm0, %v1290_v1 }
  0x2a   : > { %1209 = vmatpush3.bf16.msra.mxu0 %v1264_v16 }
  0x2b   : > { %1217 = vmatpush3.bf16.msra.mxu1 %v1265_v17 }
  0x2d   : > { %1211 = vmatmul.mubr.msk.bf16.vlgmr.msra.gmra.mxu0 %vm285_vm1, %v268_v7 }
  0x2e   : > { %1219 = vmatmul.mubr.msk.bf16.vlgmr.msra.gmra.mxu1 %vm285_vm1, %v268_v7 }
  0xd5   : > { %v323_v18 = vpop.f32.mrf.mxu0 }
  0xd6   : > { %v329_v19 = vpack.c.bf16 %v323_v18, %v323_v18  ;;  %v394_v20 = vpop.f32.mrf.mxu1 }
  0xd7   : > { %v400_v21 = vpack.c.bf16 %v394_v20, %v394_v20  ;;  %v1164_v22 = vpop.f32.mrf.mxu0 }
  0xd8   : > { %331 = vst.msk [vmem:[%s1438_s10] sm:$0xf] %vm330_vm2, %v329_v19  ;;  %v1172_v23 = vpop.f32.mrf.mxu1  ;;  %335 = vrot.lane.b32.xlu0 %v329_v19, %s1292_s11 }
  0xd9   : > { %1051 = vst.msk [vmem:[%s1438_s10 + $0x4] sm:$0xf] %vm330_vm2, %v400_v21  ;;  %406 = vrot.lane.b32.xlu1 %v400_v21, %s1292_s11  ;;  %v326_v24 = vpop.f32.mrf.mxu0 }
  0xda   : > { %v397_v25 = vpop.f32.mrf.mxu1 }
  0xdb   : > { %v1165_v26 = vpop.f32.mrf.mxu0 }
  0xdc   : > { %v1173_v27 = vpop.f32.mrf.mxu1  ;;  %339 = vrot.lane.b32.xlu0 %v329_v19, %s1293_s15 }
  0xdd   : > { %411 = vrot.lane.b32.xlu1 %v400_v21, %s1293_s15  ;;  %v467_v28 = vpop.f32.mrf.mxu0 }
  0xde   : > { %v473_v29 = vpack.c.bf16 %v467_v28, %v467_v28  ;;  %v540_v30 = vpop.f32.mrf.mxu1 }
  0xdf   : > { %v546_v31 = vpack.c.bf16 %v540_v30, %v540_v30  ;;  %v1180_v32 = vpop.f32.mrf.mxu0 }
  0xe0   : > { %1062 = vst.msk [vmem:[%s1438_s10 + $0x8] sm:$0xf] %vm330_vm2, %v473_v29  ;;  %v1188_v33 = vpop.f32.mrf.mxu1  ;;  %479 = vrot.lane.b32.xlu0 %v473_v29, %s1292_s11 }
  0xe1   : > { %1073 = vst.msk [vmem:[%s1438_s10 + $0xc] sm:$0xf] %vm330_vm2, %v546_v31  ;;  %484 = vrot.lane.b32.xlu1 %v473_v29, %s1293_s15  ;;  %v470_v34 = vpop.f32.mrf.mxu0 }
  0xe2   : > { %v543_v35 = vpop.f32.mrf.mxu1 }
  0xe3   : > { %v1181_v36 = vpop.f32.mrf.mxu0 }
  0xe4   : > { %v1189_v37 = vpop.f32.mrf.mxu1  ;;  %552 = vrot.lane.b32.xlu0 %v546_v31, %s1292_s11 }
  0xe5   : > { %557 = vrot.lane.b32.xlu1 %v546_v31, %s1293_s15  ;;  %v613_v38 = vpop.f32.mrf.mxu0 }
  0xe6   : > { %v686_v39 = vpop.f32.mrf.mxu1  ;;  %v619_v40 = vpack.c.bf16 %v613_v38, %v613_v38 }
  0xe7   : > { %v692_v41 = vpack.c.bf16 %v686_v39, %v686_v39  ;;  %v1196_v42 = vpop.f32.mrf.mxu0 }
  0xe8   : > { %1084 = vst.msk [vmem:[%s1438_s10 + $0x10] sm:$0xf] %vm330_vm2, %v619_v40  ;;  %v1204_v43 = vpop.f32.mrf.mxu1  ;;  %625 = vrot.lane.b32.xlu0 %v619_v40, %s1292_s11 }
  0xe9   : > { %1095 = vst.msk [vmem:[%s1438_s10 + $0x14] sm:$0xf] %vm330_vm2, %v692_v41  ;;  %630 = vrot.lane.b32.xlu1 %v619_v40, %s1293_s15  ;;  %v616_v44 = vpop.f32.mrf.mxu0 }
  0xea   : > { %v689_v45 = vpop.f32.mrf.mxu1 }
  0xeb   : > { %v1197_v46 = vpop.f32.mrf.mxu0 }
  0xec   : > { %v1205_v47 = vpop.f32.mrf.mxu1  ;;  %698 = vrot.lane.b32.xlu0 %v692_v41, %s1292_s11 }
  0xed   : > { %703 = vrot.lane.b32.xlu1 %v692_v41, %s1293_s15  ;;  %v759_v48 = vpop.f32.mrf.mxu0 }
  0xee   : > { %v832_v49 = vpop.f32.mrf.mxu1  ;;  %v765_v50 = vpack.c.bf16 %v759_v48, %v759_v48 }
  0xef   : > { %v838_v51 = vpack.c.bf16 %v832_v49, %v832_v49  ;;  %v1212_v52 = vpop.f32.mrf.mxu0 }
  0xf0   : > { %1106 = vst.msk [vmem:[%s1438_s10 + $0x18] sm:$0xf] %vm330_vm2, %v765_v50  ;;  %v1220_v53 = vpop.f32.mrf.mxu1  ;;  %771 = vrot.lane.b32.xlu0 %v765_v50, %s1292_s11 }
  0xf1   : > { %1117 = vst.msk [vmem:[%s1438_s10 + $0x1c] sm:$0xf] %vm330_vm2, %v838_v51  ;;  %776 = vrot.lane.b32.xlu1 %v765_v50, %s1293_s15  ;;  %v762_v54 = vpop.f32.mrf.mxu0 }
  0xf2   : > { %v835_v55 = vpop.f32.mrf.mxu1 }
  0xf3   : > { %v1213_v56 = vpop.f32.mrf.mxu0 }
  0xf4   : > { %v1221_v57 = vpop.f32.mrf.mxu1  ;;  %844 = vrot.lane.b32.xlu0 %v838_v51, %s1292_s11 }
  0xf5   : > { %849 = vrot.lane.b32.xlu1 %v838_v51, %s1293_s15 }
 0x14a   : > { %v336_v58 = vpop.permute.xlu0 %335 }
 0x14b   : > { %v407_v59 = vpop.permute.xlu1 %406  ;;  %338 = vst.msk [vmem:[%s1476_s14] sm:$0xf] %vm330_vm2, %v336_v58 }
 0x14c   : > { %1053 = vst.msk [vmem:[%s1476_s14 + $0x4] sm:$0xf] %vm330_vm2, %v407_v59 }
 0x14e   : > { %v340_v60 = vpop.permute.xlu0 %339 }
 0x14f   : > { %v412_v61 = vpop.permute.xlu1 %411  ;;  %342 = vst.msk [vmem:[%s266_s21] sm:$0xf] %vm330_vm2, %v340_v60 }
 0x150   : > { %1054 = vst.msk [vmem:[%s266_s21 + $0x4] sm:$0xf] %vm330_vm2, %v412_v61 }
 0x152   : > { %v480_v62 = vpop.permute.xlu0 %479 }
 0x153   : > { %v485_v63 = vpop.permute.xlu1 %484  ;;  %1064 = vst.msk [vmem:[%s1476_s14 + $0x8] sm:$0xf] %vm330_vm2, %v480_v62 }
 0x154   : > { %1065 = vst.msk [vmem:[%s266_s21 + $0x8] sm:$0xf] %vm330_vm2, %v485_v63 }
 0x156   : > { %v553_v0 = vpop.permute.xlu0 %552 }
 0x157   : > { %v558_v1 = vpop.permute.xlu1 %557  ;;  %1075 = vst.msk [vmem:[%s1476_s14 + $0xc] sm:$0xf] %vm330_vm2, %v553_v0 }
 0x158   : > { %1076 = vst.msk [vmem:[%s266_s21 + $0xc] sm:$0xf] %vm330_vm2, %v558_v1 }
 0x15a   : > { %v626_v2 = vpop.permute.xlu0 %625 }
 0x15b   : > { %v631_v3 = vpop.permute.xlu1 %630  ;;  %1086 = vst.msk [vmem:[%s1476_s14 + $0x10] sm:$0xf] %vm330_vm2, %v626_v2 }
 0x15c   : > { %1087 = vst.msk [vmem:[%s266_s21 + $0x10] sm:$0xf] %vm330_vm2, %v631_v3 }
 0x15e   : > { %v699_v4 = vpop.permute.xlu0 %698 }
 0x15f   : > { %v704_v5 = vpop.permute.xlu1 %703  ;;  %1097 = vst.msk [vmem:[%s1476_s14 + $0x14] sm:$0xf] %vm330_vm2, %v699_v4 }
 0x160   : > { %1098 = vst.msk [vmem:[%s266_s21 + $0x14] sm:$0xf] %vm330_vm2, %v704_v5 }
 0x162   : > { %v772_v6 = vpop.permute.xlu0 %771 }
 0x163   : > { %v777_v7 = vpop.permute.xlu1 %776  ;;  %1108 = vst.msk [vmem:[%s1476_s14 + $0x18] sm:$0xf] %vm330_vm2, %v772_v6 }
 0x164   : > { %1109 = vst.msk [vmem:[%s266_s21 + $0x18] sm:$0xf] %vm330_vm2, %v777_v7 }
 0x166   : > { %v845_v8 = vpop.permute.xlu0 %844 }
 0x167   : > { %v850_v9 = vpop.permute.xlu1 %849  ;;  %1119 = vst.msk [vmem:[%s1476_s14 + $0x1c] sm:$0xf] %vm330_vm2, %v845_v8 }
 0x168   : > { %1120 = vst.msk [vmem:[%s266_s21 + $0x1c] sm:$0xf] %vm330_vm2, %v850_v9 }
 0x169 PF: > { %s15_s17 = sadd.s32 1, %s1288_s17   ;;  %s1520_s15 = smov %s1284_s16 }
 0x16a   : > { %p12_p5 = scmp.ge.s32.totalorder %s15_s17, 4   ;;  %s1521_s16 = smov %s1523_s18 }
 0x16c   :  { %14 = sbr.rel (!%p12_p5) target bundleno = 2 (0x2), region = 110 }

// kernel: tpu_custom_call.1
= control target key start
LH: loop header
LB: loop body
LE: loop exit
PB: predicated region body
PF: predicated region fallthrough
CT: control target
= control target key end

     0   :  { %s1319_s15 = smov 0   ;;  %s1321_s16 = smov 0   ;;  %s1515_s0 = inlined_call_operand.vmem [shape: bf16[2,8,32], index: 0, kind: input, shape index: {}]   ;;  %s1516_s1 = inlined_call_operand.vmem [shape: bf16[8,32,12], index: 1, kind: input, shape index: {}]   ;;  %s1517_s2 = inlined_call_operand.vmem [shape: bf16[2,8,8,4], index: 2, kind: output, shape index: {0}]   ;;  %s1518_s3 = inlined_call_operand.vmem [shape: bf16[2,8,8,4], index: 3, kind: output, shape index: {1}]   ;;  %s1519_s4 = inlined_call_operand.vmem [shape: bf16[2,8,8,4], index: 4, kind: output, shape index: {2}]  }
   0x1   :  { %s1323_s17 = smov 0  }
   0x2 LB: > { %s27_s18 = sadd.s32 1, %s1284_s16  ;;  %p1032_p0 = scmp.ge.s32.totalorder %s1288_s17, 1  ;;  %s1288_s17 = sphi %s1323_s17, %s15_s17   ;;  %s1284_s16 = sphi %s1321_s16, %s1521_s16   ;;  %s1280_s15 = sphi %s1319_s15, %s1520_s15  }
   0x3   : > { %p29_p1 = scmp.ge.s32.totalorder %s27_s18, 2  ;;  %p189_p2 = scmp.lt.s32.totalorder %s1288_s17, 3 }
   0x5   : > { %s1523_s18 = smov (%p29_p1, %s27_s18), 0  ;;  %p190_p3 = pnand %p1032_p0, %p189_p2 }
   0x6   : > { %p236_p4 = scmp.lt.s32.totalorder (!%p190_p3), %s1280_s15, 1  ;;  %s1292_s11 = smov (!%p190_p3), 124  }
   0x7   : > { %193 = sbr.rel (%p190_p3) target bundleno = 361 (0x169), region = 28 }
   0xc   : > { %v1250_v0 = vld [vmem:[%s1516_s1 + $0x8] sm:$0xff]   ;;  %v1290_v1 = vmov 0.0   ;;  %v1251_v2 = vld [vmem:[%s1516_s1 + $0x18] sm:$0xff]   ;;  %v1252_v3 = vld [vmem:[%s1516_s1] sm:$0xff]   ;;  %vm1291_vm0 = vmmov 0   ;;  %s1525_s15 = smov (!%p236_p4, %s1280_s15), 1 }
   0xd   : > { %1158 = vmatprep.subr.bf16.mxu0 %v1290_v1  ;;  %1166 = vmatprep.subr.bf16.mxu1 %v1290_v1  ;;  %v1253_v4 = vld [vmem:[%s1516_s1 + $0x10] sm:$0xff]   ;;  %vm285_vm1 = vcmask 261120   ;;  %s1033_s27 = sshll.u32 %s1525_s15, 2  ;;  %v1254_v5 = vld [vmem:[%s1516_s1 + $0x28] sm:$0xff]   ;;  %v1255_v6 = vld [vmem:[%s1516_s1 + $0x38] sm:$0xff]   ;;  %s1432_s7 = sshll.u32 %s1525_s15, 5 }
   0xe   : > { %1159 = vmatpush3.bf16.msra.mxu0 %v1250_v0  ;;  %1162 = vmatprep.mubr.msk.bf16.mxu0 %vm1291_vm0, %v1290_v1  ;;  %s242_s6 = scalar_lea.vmem %s1515_s0, %s1033_s27  ;;  %v1256_v8 = vld [vmem:[%s1516_s1 + $0x20] sm:$0xff]   ;;  %v1257_v9 = vld [vmem:[%s1516_s1 + $0x30] sm:$0xff]   ;;  %v1258_v10 = vld [vmem:[%s1516_s1 + $0x48] sm:$0xff]   ;;  %s1438_s10 = scalar_lea.vmem %s1517_s2, %s1432_s7  ;;  %vm330_vm2 = vcmask 27648  }
   0xf   : > { %1167 = vmatpush3.bf16.msra.mxu1 %v1251_v2  ;;  %1160 = vmatprep.subr.bf16.mxu0 %v1290_v1  ;;  %v268_v7 = vld [vmem:[%s242_s6] sm:$0xf]  ;;  %v1259_v11 = vld [vmem:[%s1516_s1 + $0x58] sm:$0xff]   ;;  %v1261_v13 = vld [vmem:[%s1516_s1 + $0x50] sm:$0xff]   ;;  %s1293_s15 = smov 120   ;;  %s1476_s14 = scalar_lea.vmem %s1518_s3, %s1432_s7 }
  0x10   : > { %1168 = vmatprep.subr.bf16.mxu1 %v1290_v1  ;;  %1170 = vmatprep.mubr.msk.bf16.mxu1 %vm1291_vm0, %v1290_v1  ;;  %v1260_v12 = vld [vmem:[%s1516_s1 + $0x40] sm:$0xff]   ;;  %v1262_v14 = vld [vmem:[%s1516_s1 + $0x68] sm:$0xff]   ;;  %v1263_v15 = vld [vmem:[%s1516_s1 + $0x78] sm:$0xff]   ;;  %s266_s21 = scalar_lea.vmem %s1519_s4, %s1432_s7 }
  0x11   : > { %v1264_v16 = vld [vmem:[%s1516_s1 + $0x60] sm:$0xff]   ;;  %v1265_v17 = vld [vmem:[%s1516_s1 + $0x70] sm:$0xff]  }
  0x12   : > { %1161 = vmatpush3.bf16.msra.mxu0 %v1252_v3 }
  0x13   : > { %1169 = vmatpush3.bf16.msra.mxu1 %v1253_v4  ;;  %1174 = vmatprep.subr.bf16.mxu0 %v1290_v1 }
  0x14   : > { %1182 = vmatprep.subr.bf16.mxu1 %v1290_v1 }
  0x15   : > { %1163 = vmatmul.mubr.msk.bf16.vlgmr.msra.gmra.mxu0 %vm285_vm1, %v268_v7 }
  0x16   : > { %1171 = vmatmul.mubr.msk.bf16.vlgmr.msra.gmra.mxu1 %vm285_vm1, %v268_v7  ;;  %1175 = vmatpush3.bf16.msra.mxu0 %v1254_v5 }
  0x17   : > { %1183 = vmatpush3.bf16.msra.mxu1 %v1255_v6  ;;  %1176 = vmatprep.subr.bf16.mxu0 %v1290_v1 }
  0x18   : > { %1184 = vmatprep.subr.bf16.mxu1 %v1290_v1  ;;  %1178 = vmatprep.mubr.msk.bf16.mxu0 %vm1291_vm0, %v1290_v1 }
  0x19   : > { %1186 = vmatprep.mubr.msk.bf16.mxu1 %vm1291_vm0, %v1290_v1 }
  0x1a   : > { %1177 = vmatpush3.bf16.msra.mxu0 %v1256_v8 }
  0x1b   : > { %1185 = vmatpush3.bf16.msra.mxu1 %v1257_v9  ;;  %1190 = vmatprep.subr.bf16.mxu0 %v1290_v1 }
  0x1c   : > { %1198 = vmatprep.subr.bf16.mxu1 %v1290_v1 }
  0x1d   : > { %1179 = vmatmul.mubr.msk.bf16.vlgmr.msra.gmra.mxu0 %vm285_vm1, %v268_v7 }
  0x1e   : > { %1187 = vmatmul.mubr.msk.bf16.vlgmr.msra.gmra.mxu1 %vm285_vm1, %v268_v7  ;;  %1191 = vmatpush3.bf16.msra.mxu0 %v1258_v10 }
  0x1f   : > { %1199 = vmatpush3.bf16.msra.mxu1 %v1259_v11  ;;  %1192 = vmatprep.subr.bf16.mxu0 %v1290_v1 }
  0x20   : > { %1200 = vmatprep.subr.bf16.mxu1 %v1290_v1  ;;  %1194 = vmatprep.mubr.msk.bf16.mxu0 %vm1291_vm0, %v1290_v1 }
  0x21   : > { %1202 = vmatprep.mubr.msk.bf16.mxu1 %vm1291_vm0, %v1290_v1 }
  0x22   : > { %1193 = vmatpush3.bf16.msra.mxu0 %v1260_v12 }
  0x23   : > { %1201 = vmatpush3.bf16.msra.mxu1 %v1261_v13  ;;  %1206 = vmatprep.subr.bf16.mxu0 %v1290_v1 }
  0x24   : > { %1214 = vmatprep.subr.bf16.mxu1 %v1290_v1 }
  0x25   : > { %1195 = vmatmul.mubr.msk.bf16.vlgmr.msra.gmra.mxu0 %vm285_vm1, %v268_v7 }
  0x26   : > { %1203 = vmatmul.mubr.msk.bf16.vlgmr.msra.gmra.mxu1 %vm285_vm1, %v268_v7  ;;  %1207 = vmatpush3.bf16.msra.mxu0 %v1262_v14 }
  0x27   : > { %1215 = vmatpush3.bf16.msra.mxu1 %v1263_v15  ;;  %1208 = vmatprep.subr.bf16.mxu0 %v1290_v1 }
  0x28   : > { %1216 = vmatprep.subr.bf16.mxu1 %v1290_v1  ;;  %1210 = vmatprep.mubr.msk.bf16.mxu0 %vm1291_vm0, %v1290_v1 }
  0x29   : > { %1218 = vmatprep.mubr.msk.bf16.mxu1 %vm1291_vm0, %v1290_v1 }
  0x2a   : > { %1209 = vmatpush3.bf16.msra.mxu0 %v1264_v16 }
  0x2b   : > { %1217 = vmatpush3.bf16.msra.mxu1 %v1265_v17 }
  0x2d   : > { %1211 = vmatmul.mubr.msk.bf16.vlgmr.msra.gmra.mxu0 %vm285_vm1, %v268_v7 }
  0x2e   : > { %1219 = vmatmul.mubr.msk.bf16.vlgmr.msra.gmra.mxu1 %vm285_vm1, %v268_v7 }
  0xd5   : > { %v323_v18 = vpop.f32.mrf.mxu0 }
  0xd6   : > { %v329_v19 = vpack.c.bf16 %v323_v18, %v323_v18  ;;  %v394_v20 = vpop.f32.mrf.mxu1 }
  0xd7   : > { %v400_v21 = vpack.c.bf16 %v394_v20, %v394_v20  ;;  %v1164_v22 = vpop.f32.mrf.mxu0 }
  0xd8   : > { %331 = vst.msk [vmem:[%s1438_s10] sm:$0xf] %vm330_vm2, %v329_v19  ;;  %v1172_v23 = vpop.f32.mrf.mxu1  ;;  %335 = vrot.lane.b32.xlu0 %v329_v19, %s1292_s11 }
  0xd9   : > { %1051 = vst.msk [vmem:[%s1438_s10 + $0x4] sm:$0xf] %vm330_vm2, %v400_v21  ;;  %406 = vrot.lane.b32.xlu1 %v400_v21, %s1292_s11  ;;  %v326_v24 = vpop.f32.mrf.mxu0 }
  0xda   : > { %v397_v25 = vpop.f32.mrf.mxu1 }
  0xdb   : > { %v1165_v26 = vpop.f32.mrf.mxu0 }
  0xdc   : > { %v1173_v27 = vpop.f32.mrf.mxu1  ;;  %339 = vrot.lane.b32.xlu0 %v329_v19, %s1293_s15 }
  0xdd   : > { %411 = vrot.lane.b32.xlu1 %v400_v21, %s1293_s15  ;;  %v467_v28 = vpop.f32.mrf.mxu0 }
  0xde   : > { %v473_v29 = vpack.c.bf16 %v467_v28, %v467_v28  ;;  %v540_v30 = vpop.f32.mrf.mxu1 }
  0xdf   : > { %v546_v31 = vpack.c.bf16 %v540_v30, %v540_v30  ;;  %v1180_v32 = vpop.f32.mrf.mxu0 }
  0xe0   : > { %1062 = vst.msk [vmem:[%s1438_s10 + $0x8] sm:$0xf] %vm330_vm2, %v473_v29  ;;  %v1188_v33 = vpop.f32.mrf.mxu1  ;;  %479 = vrot.lane.b32.xlu0 %v473_v29, %s1292_s11 }
  0xe1   : > { %1073 = vst.msk [vmem:[%s1438_s10 + $0xc] sm:$0xf] %vm330_vm2, %v546_v31  ;;  %484 = vrot.lane.b32.xlu1 %v473_v29, %s1293_s15  ;;  %v470_v34 = vpop.f32.mrf.mxu0 }
  0xe2   : > { %v543_v35 = vpop.f32.mrf.mxu1 }
  0xe3   : > { %v1181_v36 = vpop.f32.mrf.mxu0 }
  0xe4   : > { %v1189_v37 = vpop.f32.mrf.mxu1  ;;  %552 = vrot.lane.b32.xlu0 %v546_v31, %s1292_s11 }
  0xe5   : > { %557 = vrot.lane.b32.xlu1 %v546_v31, %s1293_s15  ;;  %v613_v38 = vpop.f32.mrf.mxu0 }
  0xe6   : > { %v686_v39 = vpop.f32.mrf.mxu1  ;;  %v619_v40 = vpack.c.bf16 %v613_v38, %v613_v38 }
  0xe7   : > { %v692_v41 = vpack.c.bf16 %v686_v39, %v686_v39  ;;  %v1196_v42 = vpop.f32.mrf.mxu0 }
  0xe8   : > { %1084 = vst.msk [vmem:[%s1438_s10 + $0x10] sm:$0xf] %vm330_vm2, %v619_v40  ;;  %v1204_v43 = vpop.f32.mrf.mxu1  ;;  %625 = vrot.lane.b32.xlu0 %v619_v40, %s1292_s11 }
  0xe9   : > { %1095 = vst.msk [vmem:[%s1438_s10 + $0x14] sm:$0xf] %vm330_vm2, %v692_v41  ;;  %630 = vrot.lane.b32.xlu1 %v619_v40, %s1293_s15  ;;  %v616_v44 = vpop.f32.mrf.mxu0 }
  0xea   : > { %v689_v45 = vpop.f32.mrf.mxu1 }
  0xeb   : > { %v1197_v46 = vpop.f32.mrf.mxu0 }
  0xec   : > { %v1205_v47 = vpop.f32.mrf.mxu1  ;;  %698 = vrot.lane.b32.xlu0 %v692_v41, %s1292_s11 }
  0xed   : > { %703 = vrot.lane.b32.xlu1 %v692_v41, %s1293_s15  ;;  %v759_v48 = vpop.f32.mrf.mxu0 }
  0xee   : > { %v832_v49 = vpop.f32.mrf.mxu1  ;;  %v765_v50 = vpack.c.bf16 %v759_v48, %v759_v48 }
  0xef   : > { %v838_v51 = vpack.c.bf16 %v832_v49, %v832_v49  ;;  %v1212_v52 = vpop.f32.mrf.mxu0 }
  0xf0   : > { %1106 = vst.msk [vmem:[%s1438_s10 + $0x18] sm:$0xf] %vm330_vm2, %v765_v50  ;;  %v1220_v53 = vpop.f32.mrf.mxu1  ;;  %771 = vrot.lane.b32.xlu0 %v765_v50, %s1292_s11 }
  0xf1   : > { %1117 = vst.msk [vmem:[%s1438_s10 + $0x1c] sm:$0xf] %vm330_vm2, %v838_v51  ;;  %776 = vrot.lane.b32.xlu1 %v765_v50, %s1293_s15  ;;  %v762_v54 = vpop.f32.mrf.mxu0 }
  0xf2   : > { %v835_v55 = vpop.f32.mrf.mxu1 }
  0xf3   : > { %v1213_v56 = vpop.f32.mrf.mxu0 }
  0xf4   : > { %v1221_v57 = vpop.f32.mrf.mxu1  ;;  %844 = vrot.lane.b32.xlu0 %v838_v51, %s1292_s11 }
  0xf5   : > { %849 = vrot.lane.b32.xlu1 %v838_v51, %s1293_s15 }
 0x14a   : > { %v336_v58 = vpop.permute.xlu0 %335 }
 0x14b   : > { %v407_v59 = vpop.permute.xlu1 %406  ;;  %338 = vst.msk [vmem:[%s1476_s14] sm:$0xf] %vm330_vm2, %v336_v58 }
 0x14c   : > { %1053 = vst.msk [vmem:[%s1476_s14 + $0x4] sm:$0xf] %vm330_vm2, %v407_v59 }
 0x14e   : > { %v340_v60 = vpop.permute.xlu0 %339 }
 0x14f   : > { %v412_v61 = vpop.permute.xlu1 %411  ;;  %342 = vst.msk [vmem:[%s266_s21] sm:$0xf] %vm330_vm2, %v340_v60 }
 0x150   : > { %1054 = vst.msk [vmem:[%s266_s21 + $0x4] sm:$0xf] %vm330_vm2, %v412_v61 }
 0x152   : > { %v480_v62 = vpop.permute.xlu0 %479 }
 0x153   : > { %v485_v63 = vpop.permute.xlu1 %484  ;;  %1064 = vst.msk [vmem:[%s1476_s14 + $0x8] sm:$0xf] %vm330_vm2, %v480_v62 }
 0x154   : > { %1065 = vst.msk [vmem:[%s266_s21 + $0x8] sm:$0xf] %vm330_vm2, %v485_v63 }
 0x156   : > { %v553_v0 = vpop.permute.xlu0 %552 }
 0x157   : > { %v558_v1 = vpop.permute.xlu1 %557  ;;  %1075 = vst.msk [vmem:[%s1476_s14 + $0xc] sm:$0xf] %vm330_vm2, %v553_v0 }
 0x158   : > { %1076 = vst.msk [vmem:[%s266_s21 + $0xc] sm:$0xf] %vm330_vm2, %v558_v1 }
 0x15a   : > { %v626_v2 = vpop.permute.xlu0 %625 }
 0x15b   : > { %v631_v3 = vpop.permute.xlu1 %630  ;;  %1086 = vst.msk [vmem:[%s1476_s14 + $0x10] sm:$0xf] %vm330_vm2, %v626_v2 }
 0x15c   : > { %1087 = vst.msk [vmem:[%s266_s21 + $0x10] sm:$0xf] %vm330_vm2, %v631_v3 }
 0x15e   : > { %v699_v4 = vpop.permute.xlu0 %698 }
 0x15f   : > { %v704_v5 = vpop.permute.xlu1 %703  ;;  %1097 = vst.msk [vmem:[%s1476_s14 + $0x14] sm:$0xf] %vm330_vm2, %v699_v4 }
 0x160   : > { %1098 = vst.msk [vmem:[%s266_s21 + $0x14] sm:$0xf] %vm330_vm2, %v704_v5 }
 0x162   : > { %v772_v6 = vpop.permute.xlu0 %771 }
 0x163   : > { %v777_v7 = vpop.permute.xlu1 %776  ;;  %1108 = vst.msk [vmem:[%s1476_s14 + $0x18] sm:$0xf] %vm330_vm2, %v772_v6 }
 0x164   : > { %1109 = vst.msk [vmem:[%s266_s21 + $0x18] sm:$0xf] %vm330_vm2, %v777_v7 }
 0x166   : > { %v845_v8 = vpop.permute.xlu0 %844 }
 0x167   : > { %v850_v9 = vpop.permute.xlu1 %849  ;;  %1119 = vst.msk [vmem:[%s1476_s14 + $0x1c] sm:$0xf] %vm330_vm2, %v845_v8 }
 0x168   : > { %1120 = vst.msk [vmem:[%s266_s21 + $0x1c] sm:$0xf] %vm330_vm2, %v850_v9 }
 0x169 PF: > { %s15_s17 = sadd.s32 1, %s1288_s17   ;;  %s1520_s15 = smov %s1284_s16 }
 0x16a   : > { %p12_p5 = scmp.ge.s32.totalorder %s15_s17, 4   ;;  %s1521_s16 = smov %s1523_s18 }
 0x16c   :  { %14 = sbr.rel (!%p12_p5) target bundleno = 2 (0x2), region = 110 }

</bundles_post_ra>
